<compile_context>
chip_gen: v6e
topology: v6e:2x2x1
jax: 0.10.0
libtpu: 0.0.40
codegen_flags: <defaults>
</compile_context>

<pallas_src>
import functools
import numpy as np

import jax
import jax.numpy as jnp
from jax.experimental import pallas as pl
from jax.experimental.pallas import tpu as pltpu

# ---------------- small deterministic config ----------------
HIDDEN = 64      # Config.bert_hidden (small stand-in for 768)
EMB = 64         # emb_size
BLOCK = 8        # Config.bilinear_block_size
REL = 2          # Config.relation_num  (NA / Pos)
UNET_IN = 3      # unet_in_dim
UNET_OUT = 32    # unet_out_dim (small stand-in for 256)
NE = 8           # max_height / min_height (small stand-in for 36)
HEADS = 4        # attention heads
SEQ = 128        # sequence length c
BS = 2           # batch size
LANE = 128       # TPU lane width -- kernel operands/outputs padded to this

D_PAD = ((HIDDEN + LANE - 1) // LANE) * LANE       # 128
EMB_PAD = ((EMB + LANE - 1) // LANE) * LANE        # 128
TM_PAIR = 128                                      # pair-row tile
APPROX_RECIP = True   # gate the EUP approximate reciprocal in the row-normalize


# ======================= Pallas kernels =======================

def _channel_map_kernel(att_ref, seqw_ref, b_ref, o_ref, *, heads):
    """Per batch: per-head pairwise attention products accumulated in-place,
    row-normalize (1/heads folded into the denominator), then a single
    lane-dense contraction against the liner+unet pre-projected sequence."""
    _, ne, C = att_ref.shape                          # (HEADS, NE, C) after squeeze

    def head_body(h, acc):
        a = att_ref[h]                                # (NE, C)
        return acc + a[:, None, :] * a[None, :, :]    # (NE, NE, C)

    ht = jax.lax.fori_loop(0, heads, head_body,
                           jnp.zeros((ne, ne, C), jnp.float32), unroll=True)
    # (s/heads) / (s.sum/heads + 1e-5) == s / (s.sum + heads*1e-5)
    denom = jnp.sum(ht, axis=-1, keepdims=True) + heads * 1e-5
    ht = ht * pl.reciprocal(denom, approx=APPROX_RECIP)          # EUP slot
    y = jnp.dot(ht.reshape(ne * ne, C), seqw_ref[...],
                preferred_element_type=jnp.float32) + b_ref[...]
    o_ref[...] = y.astype(o_ref.dtype)


def pallas_channel_attn_map(entity_att, seqw, b_lu_pad):
    """entity_att: (BS, H, NE, C), seqw: (BS, C, LANE) -> (BS*NE*NE, LANE)."""
    bs, heads, ne, C = entity_att.shape
    return pl.pallas_call(
        functools.partial(_channel_map_kernel, heads=heads),
        out_shape=jax.ShapeDtypeStruct((bs * ne * ne, LANE), jnp.float32),
        grid=(bs,),
        in_specs=[pl.BlockSpec((None, heads, ne, C), lambda b: (b, 0, 0, 0)),
                  pl.BlockSpec((None, C, LANE), lambda b: (b, 0, 0)),
                  pl.BlockSpec((1, LANE), lambda b: (0, 0))],
        out_specs=pl.BlockSpec((ne * ne, LANE), lambda b: (b, 0)),
        compiler_params=pltpu.CompilerParams(
            dimension_semantics=("parallel",)),       # one batch per TC on v7x
    )(entity_att, seqw, b_lu_pad)


def _pair_tail_kernel(hrow_ref, trow_ref, htrow_ref, emb_ref, attn_ref,
                      whs_ref, whu_ref, bh_ref, wts_ref, wtu_ref, bt_ref,
                      mt_ref, bb_ref, o_ref, *, rel):
    """Per pair-row tile: in-kernel one-hot gathers of hs/ts/h_t, split-K
    tanh extractors, reassociated grouped-bilinear + classifier."""
    f32 = jnp.float32
    tm = o_ref.shape[0]
    n_ent = emb_ref.shape[0]
    n_map = attn_ref.shape[0]

    # ---- in-kernel gathers as one-hot matmuls (no host take/concat glue) ----
    ent_iota = jax.lax.broadcasted_iota(jnp.int32, (tm, n_ent), 1)
    hs = jnp.dot((ent_iota == hrow_ref[...]).astype(f32), emb_ref[...],
                 preferred_element_type=f32)                       # (TM, D_PAD)
    ts = jnp.dot((ent_iota == trow_ref[...]).astype(f32), emb_ref[...],
                 preferred_element_type=f32)
    map_iota = jax.lax.broadcasted_iota(jnp.int32, (tm, n_map), 1)
    h_t = jnp.dot((map_iota == htrow_ref[...]).astype(f32), attn_ref[...],
                  preferred_element_type=f32)                      # (TM, LANE)

    # ---- extractors: split-K (hidden chunk + unet chunk) + tanh ----
    hs_e = jnp.tanh(jnp.dot(hs, whs_ref[...], preferred_element_type=f32)
                    + jnp.dot(h_t, whu_ref[...], preferred_element_type=f32)
                    + bh_ref[...])                                 # (TM, EMB_PAD)
    ts_e = jnp.tanh(jnp.dot(ts, wts_ref[...], preferred_element_type=f32)
                    + jnp.dot(h_t, wtu_ref[...], preferred_element_type=f32)
                    + bt_ref[...])

    # ---- grouped bilinear + classifier, reassociated per relation:
    #      logits[:, r] = rowsum(hs_e * (ts_e @ Mt[r])) + bias[r] ----
    lane_iota = jax.lax.broadcasted_iota(jnp.int32, (tm, o_ref.shape[1]), 1)
    acc = jnp.zeros((tm, o_ref.shape[1]), f32) + bb_ref[...]       # lane-dense slab
    for r in range(rel):                                           # REL is tiny/static
        tmp = jnp.dot(ts_e, mt_ref[r], preferred_element_type=f32)  # (TM, EMB_PAD)
        col = jnp.sum(hs_e * tmp, axis=1, keepdims=True)            # (TM, 1)
        acc = acc + jnp.where(lane_iota == r, col, 0.0)
    o_ref[...] = acc.astype(o_ref.dtype)


def pallas_pair_tail(h_rows, t_rows, ht_rows, emb_pad, attn_flat,
                     whs, whu, bh, wts, wtu, bt, mt, bb, *, tm=TM_PAIR):
    n_pad = h_rows.shape[0]
    e_pad, d_pad = emb_pad.shape
    n_map, lane = attn_flat.shape
    emb_p = whs.shape[1]
    rel = mt.shape[0]
    nt = n_pad // tm
    return pl.pallas_call(
        functools.partial(_pair_tail_kernel, rel=rel),
        out_shape=jax.ShapeDtypeStruct((n_pad, LANE), jnp.float32),
        grid=(nt,),
        in_specs=[pl.BlockSpec((tm, 1), lambda t: (t, 0)),
                  pl.BlockSpec((tm, 1), lambda t: (t, 0)),
                  pl.BlockSpec((tm, 1), lambda t: (t, 0)),
                  pl.BlockSpec((e_pad, d_pad), lambda t: (0, 0)),
                  pl.BlockSpec((n_map, lane), lambda t: (0, 0)),
                  pl.BlockSpec((d_pad, emb_p), lambda t: (0, 0)),
                  pl.BlockSpec((lane, emb_p), lambda t: (0, 0)),
                  pl.BlockSpec((1, emb_p), lambda t: (0, 0)),
                  pl.BlockSpec((d_pad, emb_p), lambda t: (0, 0)),
                  pl.BlockSpec((lane, emb_p), lambda t: (0, 0)),
                  pl.BlockSpec((1, emb_p), lambda t: (0, 0)),
                  pl.BlockSpec((rel, emb_p, emb_p), lambda t: (0, 0, 0)),
                  pl.BlockSpec((1, LANE), lambda t: (0, 0))],
        out_specs=pl.BlockSpec((tm, LANE), lambda t: (t, 0)),
        compiler_params=pltpu.CompilerParams(
            dimension_semantics=("parallel",)),
    )(h_rows, t_rows, ht_rows, emb_pad, attn_flat,
      whs, whu, bh, wts, wtu, bt, mt, bb)


# ======================= host-side (one-time) preparation =======================

def prepare_params(p):
    f32 = jnp.float32
    # TODO(synk): the liner+unet fold is only valid while the AttentionUNet
    # stand-in is a purely linear 1x1 conv; a real U-Net needs the 3-ch intermediate.
    w_lu = p["liner_w"] @ p["unet_w"]                          # (HIDDEN, UNET_OUT)
    b_lu = p["liner_b"] @ p["unet_w"] + p["unet_b"]            # (UNET_OUT,)
    w_lu_pad = jnp.zeros((HIDDEN, LANE), f32).at[:, :UNET_OUT].set(w_lu)
    b_lu_pad = jnp.zeros((1, LANE), f32).at[0, :UNET_OUT].set(b_lu)

    def pad2(w, rows, cols):
        return jnp.zeros((rows, cols), f32).at[:w.shape[0], :w.shape[1]].set(w)

    # split-K extractor weights (hidden chunk / unet chunk), zero-padded to full
    # 128-lane contraction + output dims (tanh(0 + 0) = 0 => padding is exact).
    whs = pad2(p["head_w"][:HIDDEN], D_PAD, EMB_PAD)
    whu = pad2(p["head_w"][HIDDEN:], LANE, EMB_PAD)
    bh = jnp.zeros((1, EMB_PAD), f32).at[0, :EMB].set(p["head_b"])
    wts = pad2(p["tail_w"][:HIDDEN], D_PAD, EMB_PAD)
    wtu = pad2(p["tail_w"][HIDDEN:], LANE, EMB_PAD)
    bt = jnp.zeros((1, EMB_PAD), f32).at[0, :EMB].set(p["tail_b"])

    # grouped bilinear + classifier reassociated into per-relation bilinear
    # forms:  Mt[r, i*B+k, i*B+j] = bil_w[i*B*B + j*B + k, r]  (block-diagonal),
    # so  logits[n, r] = sum_{p} hs_e[n, p] * (ts_e @ Mt[r])[n, p].
    bil_w = np.asarray(p["bil_w"], np.float32)
    mt = np.zeros((REL, EMB_PAD, EMB_PAD), np.float32)
    for pp in range(EMB):
        i, j = divmod(pp, BLOCK)
        for k in range(BLOCK):
            q = i * BLOCK + k
            mt[:, q, pp] = bil_w[i * BLOCK * BLOCK + j * BLOCK + k, :]
    bb = jnp.zeros((1, LANE), f32).at[0, :REL].set(p["bil_b"])
    return dict(w_lu_pad=w_lu_pad, b_lu_pad=b_lu_pad,
                whs=whs, whu=whu, bh=bh, wts=wts, wtu=wtu, bt=bt,
                mt=jnp.asarray(mt), bb=bb)


def build_static_indices(entity_pos, hts, seq_len, ne, pad_to):
    """Numpy-only: flatten the python entity/pair lists into gather tables."""
    counts = [len(ep) for ep in entity_pos]
    offsets = np.concatenate([[0], np.cumsum(counts)]).astype(np.int32)
    n_ent = int(offsets[-1])
    max_m = max(len(e) for ep in entity_pos for e in ep)

    m_idx = np.zeros((n_ent, max_m), np.int32)     # flat (b*seq + pos) per mention
    m_msk = np.zeros((n_ent, max_m), np.float32)   # 1 where mention pos < seq_len
    row = 0
    for b, ep in enumerate(entity_pos):
        for e in ep:
            for k, s in enumerate(e):
                if s < seq_len:
                    m_idx[row, k] = b * seq_len + s
                    m_msk[row, k] = 1.0
            row += 1

    # entity -> attention row, padded with the LAST entity (as in reference get_hrt)
    ent_sel = np.zeros((len(entity_pos), ne), np.int32)
    for b, ep in enumerate(entity_pos):
        n = len(ep)
        ent_sel[b, :n] = offsets[b] + np.arange(n)
        ent_sel[b, n:] = offsets[b] + n - 1

    n_pairs = sum(len(p) for p in hts)
    n_pad = ((n_pairs + pad_to - 1) // pad_to) * pad_to
    h_rows = np.zeros((n_pad, 1), np.int32)
    t_rows = np.zeros((n_pad, 1), np.int32)
    ht_rows = np.zeros((n_pad, 1), np.int32)        # rows of the (bs*ne*ne, .) map
    r = 0
    for b, pairs in enumerate(hts):
        for (h, t) in pairs:
            h_rows[r, 0] = offsets[b] + h
            t_rows[r, 0] = offsets[b] + t
            ht_rows[r, 0] = b * ne * ne + h * ne + t
            r += 1
    idx = dict(m_idx=m_idx, m_msk=m_msk, ent_sel=ent_sel,
               h_rows=h_rows, t_rows=t_rows, ht_rows=ht_rows)
    return idx, n_pairs


# ======================= forward =======================

def forward_main(prep, idx, sequence_output, attention, n_pairs):
    # TODO(synk): BertModel / process_long_input not reproducible here;
    # sequence_output & attention stand in for the encoder outputs.
    bs, seq_len, d = sequence_output.shape
    heads = attention.shape[1]

    # ---- vectorized get_hrt entity pooling (ragged -> batched XLA gathers) ----
    m_idx = idx["m_idx"]
    m_msk = idx["m_msk"]
    seq_flat = sequence_output.reshape(bs * seq_len, d)
    g_emb = jnp.take(seq_flat, m_idx, axis=0)                        # (E, M, D)
    emb = jax.scipy.special.logsumexp(g_emb, axis=1, b=m_msk[:, :, None])
    n_valid = jnp.sum(m_msk, axis=1)
    emb = jnp.where(n_valid[:, None] > 0, emb, 0.0)                  # (E, D)
    n_ent = emb.shape[0]
    e_pad = ((n_ent + 7) // 8) * 8
    emb_pad = jnp.zeros((e_pad, D_PAD), jnp.float32).at[:n_ent, :d].set(emb)

    att_t = jnp.transpose(attention, (0, 2, 1, 3)).reshape(bs * seq_len, heads, seq_len)
    g_att = jnp.take(att_t, m_idx, axis=0)                           # (E, M, H, C)
    e_att = jnp.sum(g_att * m_msk[:, :, None, None], axis=1)
    e_att = e_att / jnp.maximum(n_valid, 1.0)[:, None, None]         # (E, H, C)
    entity_as = jnp.transpose(e_att[idx["ent_sel"]], (0, 2, 1, 3))   # (BS, H, NE, C)

    # ---- seqW precompute: liner + 1x1-unet fold applied to the sequence as
    #      one batched XLA matmul; kernel 1 then needs a single MXU op ----
    seqw = jnp.einsum("bld,dk->blk", sequence_output, prep["w_lu_pad"])  # (BS, C, 128)

    # ---- kernel 1: channel map + context contraction (batch-parallel grid) ----
    attn_flat = pallas_channel_attn_map(entity_as, seqw, prep["b_lu_pad"])

    # ---- kernel 2: in-kernel hs/ts/h_t gathers + split-K extractors +
    #      reassociated grouped bilinear + classifier, tiled over pair rows ----
    logits_pad = pallas_pair_tail(
        idx["h_rows"], idx["t_rows"], idx["ht_rows"], emb_pad, attn_flat,
        prep["whs"], prep["whu"], prep["bh"],
        prep["wts"], prep["wtu"], prep["bt"],
        prep["mt"], prep["bb"])
    logits = logits_pad[:n_pairs, :REL]      # padded rows/lanes sliced off here

    # TODO(synk): BalancedLoss / get_label not defined in the reference; the
    # prediction stand-in is a one-hot argmax over the 2 relation classes.
    pred = jax.nn.one_hot(jnp.argmax(logits, axis=1), REL, dtype=logits.dtype)
    return pred, logits


# ======================= main =======================

if __name__ == "__main__":
    key = jax.random.PRNGKey(0)
    ks = jax.random.split(key, 8)

    # synthetic encoder outputs (stand-in for BERT encode)
    sequence_output = jax.random.normal(ks[0], (BS, SEQ, HIDDEN), jnp.float32)
    attention = jax.nn.softmax(
        jax.random.normal(ks[1], (BS, HEADS, SEQ, SEQ), jnp.float32), axis=-1)

    # deterministic parameters (shapes implied by the module __init__)
    params = {
        "liner_w": 0.05 * jax.random.normal(ks[2], (HIDDEN, UNET_IN), jnp.float32),
        "liner_b": jnp.zeros((UNET_IN,), jnp.float32),
        "unet_w": 0.05 * jax.random.normal(ks[3], (UNET_IN, UNET_OUT), jnp.float32),
        "unet_b": jnp.zeros((UNET_OUT,), jnp.float32),
        "head_w": 0.05 * jax.random.normal(ks[4], (HIDDEN + UNET_OUT, EMB), jnp.float32),
        "head_b": jnp.zeros((EMB,), jnp.float32),
        "tail_w": 0.05 * jax.random.normal(ks[5], (HIDDEN + UNET_OUT, EMB), jnp.float32),
        "tail_b": jnp.zeros((EMB,), jnp.float32),
        "bil_w": 0.05 * jax.random.normal(ks[6], (EMB * BLOCK, REL), jnp.float32),
        "bil_b": jnp.zeros((REL,), jnp.float32),
    }

    # entity mention positions (all < SEQ) and head/tail pair ids per document
    entity_pos = [
        [[3], [10, 20], [35], [50, 60, 70], [90]],
        [[5], [12], [25, 40], [55], [80, 100], [110]],
    ]
    hts = [
        [(0, 1), (1, 0), (0, 2), (2, 3), (3, 4), (4, 0)],
        [(0, 1), (1, 2), (2, 3), (3, 4), (4, 5), (5, 0), (0, 3), (2, 5)],
    ]

    prep = prepare_params(params)
    idx, n_pairs = build_static_indices(entity_pos, hts, SEQ, NE, TM_PAIR)

    fwd = jax.jit(functools.partial(forward_main, n_pairs=n_pairs))
    pred, logits = fwd(prep, idx, sequence_output, attention)
    jax.block_until_ready((pred, logits))

    assert logits.shape == (n_pairs, REL) and pred.shape == (n_pairs, REL)
    print("KERNEL_OK")
</pallas_src>

<mosaic_0001>
module attributes {stable_mosaic.version = 11 : i64} {
  func.func @_channel_map_kernel(%arg0: i32, %arg1: memref<1x4x8x128xf32, #tpu.memory_space<vmem>>, %arg2: memref<1x128x128xf32, #tpu.memory_space<vmem>>, %arg3: memref<1x128xf32, #tpu.memory_space<vmem>>, %arg4: memref<64x128xf32, #tpu.memory_space<vmem>>) attributes {dimension_semantics = [#tpu.dimension_semantics<parallel>], iteration_bounds = array<i64: 2>, scalar_prefetch = 0 : i64, scratch_operands = 0 : i64, tpu.core_type = #tpu.core_type<tc>, window_params = [{transform_indices = @transform_0, window_bounds = array<i64: 1, 4, 8, 128>}, {transform_indices = @transform_1, window_bounds = array<i64: 1, 128, 128>}, {pipeline_mode = #tpu.pipeline_mode<synchronous>, transform_indices = @transform_2, window_bounds = array<i64: 1, 128>}, {transform_indices = @transform_3, window_bounds = array<i64: 64, 128>}]} {
    %cst = arith.constant 0.000000e+00 : f32
    %0 = vector.broadcast %cst : f32 to vector<8x8x128xf32>
    %c0_i32 = arith.constant 0 : i32
    %c0 = arith.constant 0 : index
    %1 = arith.index_cast %c0_i32 : i32 to index
    %c0_0 = arith.constant 0 : index
    %c0_1 = arith.constant 0 : index
    %2 = vector.load %arg1[%c0, %1, %c0_0, %c0_1] : memref<1x4x8x128xf32, #tpu.memory_space<vmem>>, vector<1x1x8x128xf32>
    %3 = vector.shape_cast %2 : vector<1x1x8x128xf32> to vector<8x128xf32>
    %4 = vector.shape_cast %3 : vector<8x128xf32> to vector<8x1x128xf32>
    %5 = vector.shape_cast %3 : vector<8x128xf32> to vector<1x8x128xf32>
    %6 = vector.broadcast %4 : vector<8x1x128xf32> to vector<8x8x128xf32>
    %7 = vector.broadcast %5 : vector<1x8x128xf32> to vector<8x8x128xf32>
    %8 = arith.mulf %6, %7 : vector<8x8x128xf32>
    %9 = arith.addf %0, %8 : vector<8x8x128xf32>
    %c1_i32 = arith.constant 1 : i32
    %c0_2 = arith.constant 0 : index
    %10 = arith.index_cast %c1_i32 : i32 to index
    %c0_3 = arith.constant 0 : index
    %c0_4 = arith.constant 0 : index
    %11 = vector.load %arg1[%c0_2, %10, %c0_3, %c0_4] : memref<1x4x8x128xf32, #tpu.memory_space<vmem>>, vector<1x1x8x128xf32>
    %12 = vector.shape_cast %11 : vector<1x1x8x128xf32> to vector<8x128xf32>
    %13 = vector.shape_cast %12 : vector<8x128xf32> to vector<8x1x128xf32>
    %14 = vector.shape_cast %12 : vector<8x128xf32> to vector<1x8x128xf32>
    %15 = vector.broadcast %13 : vector<8x1x128xf32> to vector<8x8x128xf32>
    %16 = vector.broadcast %14 : vector<1x8x128xf32> to vector<8x8x128xf32>
    %17 = arith.mulf %15, %16 : vector<8x8x128xf32>
    %18 = arith.addf %9, %17 : vector<8x8x128xf32>
    %c2_i32 = arith.constant 2 : i32
    %c0_5 = arith.constant 0 : index
    %19 = arith.index_cast %c2_i32 : i32 to index
    %c0_6 = arith.constant 0 : index
    %c0_7 = arith.constant 0 : index
    %20 = vector.load %arg1[%c0_5, %19, %c0_6, %c0_7] : memref<1x4x8x128xf32, #tpu.memory_space<vmem>>, vector<1x1x8x128xf32>
    %21 = vector.shape_cast %20 : vector<1x1x8x128xf32> to vector<8x128xf32>
    %22 = vector.shape_cast %21 : vector<8x128xf32> to vector<8x1x128xf32>
    %23 = vector.shape_cast %21 : vector<8x128xf32> to vector<1x8x128xf32>
    %24 = vector.broadcast %22 : vector<8x1x128xf32> to vector<8x8x128xf32>
    %25 = vector.broadcast %23 : vector<1x8x128xf32> to vector<8x8x128xf32>
    %26 = arith.mulf %24, %25 : vector<8x8x128xf32>
    %27 = arith.addf %18, %26 : vector<8x8x128xf32>
    %c3_i32 = arith.constant 3 : i32
    %c0_8 = arith.constant 0 : index
    %28 = arith.index_cast %c3_i32 : i32 to index
    %c0_9 = arith.constant 0 : index
    %c0_10 = arith.constant 0 : index
    %29 = vector.load %arg1[%c0_8, %28, %c0_9, %c0_10] : memref<1x4x8x128xf32, #tpu.memory_space<vmem>>, vector<1x1x8x128xf32>
    %30 = vector.shape_cast %29 : vector<1x1x8x128xf32> to vector<8x128xf32>
    %31 = vector.shape_cast %30 : vector<8x128xf32> to vector<8x1x128xf32>
    %32 = vector.shape_cast %30 : vector<8x128xf32> to vector<1x8x128xf32>
    %33 = vector.broadcast %31 : vector<8x1x128xf32> to vector<8x8x128xf32>
    %34 = vector.broadcast %32 : vector<1x8x128xf32> to vector<8x8x128xf32>
    %35 = arith.mulf %33, %34 : vector<8x8x128xf32>
    %36 = arith.addf %27, %35 : vector<8x8x128xf32>
    %c4_i32 = arith.constant 4 : i32
    %cst_11 = arith.constant dense<0.000000e+00> : vector<8x8xf32>
    %37 = vector.multi_reduction <add>, %36, %cst_11 [2] : vector<8x8x128xf32> to vector<8x8xf32>
    %38 = vector.shape_cast %37 : vector<8x8xf32> to vector<8x8x1xf32>
    %cst_12 = arith.constant 4.000000e-05 : f32
    %39 = vector.broadcast %cst_12 : f32 to vector<8x8x1xf32>
    %40 = arith.addf %38, %39 : vector<8x8x1xf32>
    %41 = tpu.reciprocal %40 {approx = true} : vector<8x8x1xf32> -> vector<8x8x1xf32>
    %42 = vector.broadcast %41 : vector<8x8x1xf32> to vector<8x8x128xf32>
    %43 = arith.mulf %36, %42 : vector<8x8x128xf32>
    %44 = vector.shape_cast %43 : vector<8x8x128xf32> to vector<64x128xf32>
    %c0_13 = arith.constant 0 : index
    %c0_14 = arith.constant 0 : index
    %c0_15 = arith.constant 0 : index
    %45 = vector.load %arg2[%c0_13, %c0_14, %c0_15] : memref<1x128x128xf32, #tpu.memory_space<vmem>>, vector<1x128x128xf32>
    %46 = vector.shape_cast %45 : vector<1x128x128xf32> to vector<128x128xf32>
    %cst_16 = arith.constant dense<0.000000e+00> : vector<64x128xf32>
    %47 = tpu.matmul %44, %46, %cst_16 {dimension_numbers = #tpu.dot_dimension_numbers<[1], [0], [0], [1], [0, 0, 1, 1], [], []>} : vector<64x128xf32>, vector<128x128xf32>, vector<64x128xf32> -> vector<64x128xf32>
    %c0_17 = arith.constant 0 : index
    %c0_18 = arith.constant 0 : index
    %48 = vector.load %arg3[%c0_17, %c0_18] : memref<1x128xf32, #tpu.memory_space<vmem>>, vector<1x128xf32>
    %49 = vector.broadcast %48 : vector<1x128xf32> to vector<64x128xf32>
    %50 = arith.addf %47, %49 : vector<64x128xf32>
    %c0_19 = arith.constant 0 : index
    %c0_20 = arith.constant 0 : index
    %51 = vector.load %arg4[%c0_19, %c0_20] : memref<64x128xf32, #tpu.memory_space<vmem>>, vector<64x128xf32>
    tpu.vector_store %arg4[%c0_19, %c0_20], %50 {strides = array<i32>} : memref<64x128xf32, #tpu.memory_space<vmem>>, vector<64x128xf32>,
    return
  }
  func.func @transform_0(%arg0: i32) -> (i32, i32, i32, i32) {
    %c0_i32 = arith.constant 0 : i32
    %c0_i32_0 = arith.constant 0 : i32
    %c0_i32_1 = arith.constant 0 : i32
    %c0_i32_2 = arith.constant 0 : i32
    return %arg0, %c0_i32, %c0_i32_0, %c0_i32_1 : i32, i32, i32, i32
  }
  func.func @transform_1(%arg0: i32) -> (i32, i32, i32) {
    %c0_i32 = arith.constant 0 : i32
    %c0_i32_0 = arith.constant 0 : i32
    %c0_i32_1 = arith.constant 0 : i32
    return %arg0, %c0_i32, %c0_i32_0 : i32, i32, i32
  }
  func.func @transform_2(%arg0: i32) -> (i32, i32) {
    %c0_i32 = arith.constant 0 : i32
    %c0_i32_0 = arith.constant 0 : i32
    %c0_i32_1 = arith.constant 0 : i32
    return %c0_i32, %c0_i32_0 : i32, i32
  }
  func.func @transform_3(%arg0: i32) -> (i32, i32) {
    %c0_i32 = arith.constant 0 : i32
    %c0_i32_0 = arith.constant 0 : i32
    return %arg0, %c0_i32 : i32, i32
  }
}

module attributes {stable_mosaic.version = 11 : i64} {
  func.func @_pair_tail_kernel(%arg0: i32, %arg1: memref<128x1xi32, #tpu.memory_space<vmem>>, %arg2: memref<128x1xi32, #tpu.memory_space<vmem>>, %arg3: memref<128x1xi32, #tpu.memory_space<vmem>>, %arg4: memref<16x128xf32, #tpu.memory_space<vmem>>, %arg5: memref<128x128xf32, #tpu.memory_space<vmem>>, %arg6: memref<128x128xf32, #tpu.memory_space<vmem>>, %arg7: memref<128x128xf32, #tpu.memory_space<vmem>>, %arg8: memref<1x128xf32, #tpu.memory_space<vmem>>, %arg9: memref<128x128xf32, #tpu.memory_space<vmem>>, %arg10: memref<128x128xf32, #tpu.memory_space<vmem>>, %arg11: memref<1x128xf32, #tpu.memory_space<vmem>>, %arg12: memref<2x128x128xf32, #tpu.memory_space<vmem>>, %arg13: memref<1x128xf32, #tpu.memory_space<vmem>>, %arg14: memref<128x128xf32, #tpu.memory_space<vmem>>) attributes {dimension_semantics = [#tpu.dimension_semantics<parallel>], iteration_bounds = array<i64: 1>, scalar_prefetch = 0 : i64, scratch_operands = 0 : i64, tpu.core_type = #tpu.core_type<tc>, window_params = [{transform_indices = @transform_0, window_bounds = array<i64: 128, 1>}, {transform_indices = @transform_1, window_bounds = array<i64: 128, 1>}, {transform_indices = @transform_2, window_bounds = array<i64: 128, 1>}, {pipeline_mode = #tpu.pipeline_mode<synchronous>, transform_indices = @transform_3, window_bounds = array<i64: 16, 128>}, {pipeline_mode = #tpu.pipeline_mode<synchronous>, transform_indices = @transform_4, window_bounds = array<i64: 128, 128>}, {pipeline_mode = #tpu.pipeline_mode<synchronous>, transform_indices = @transform_5, window_bounds = array<i64: 128, 128>}, {pipeline_mode = #tpu.pipeline_mode<synchronous>, transform_indices = @transform_6, window_bounds = array<i64: 128, 128>}, {pipeline_mode = #tpu.pipeline_mode<synchronous>, transform_indices = @transform_7, window_bounds = array<i64: 1, 128>}, {pipeline_mode = #tpu.pipeline_mode<synchronous>, transform_indices = @transform_8, window_bounds = array<i64: 128, 128>}, {pipeline_mode = #tpu.pipeline_mode<synchronous>, transform_indices = @transform_9, window_bounds = array<i64: 128, 128>}, {pipeline_mode = #tpu.pipeline_mode<synchronous>, transform_indices = @transform_10, window_bounds = array<i64: 1, 128>}, {pipeline_mode = #tpu.pipeline_mode<synchronous>, transform_indices = @transform_11, window_bounds = array<i64: 2, 128, 128>}, {pipeline_mode = #tpu.pipeline_mode<synchronous>, transform_indices = @transform_12, window_bounds = array<i64: 1, 128>}, {transform_indices = @transform_13, window_bounds = array<i64: 128, 128>}]} {
    %0 = tpu.iota {dimensions = array<i32: 1>} : vector<128x16xi32>
    %c0 = arith.constant 0 : index
    %c0_0 = arith.constant 0 : index
    %1 = vector.load %arg1[%c0, %c0_0] : memref<128x1xi32, #tpu.memory_space<vmem>>, vector<128x1xi32>
    %2 = vector.broadcast %1 : vector<128x1xi32> to vector<128x16xi32>
    %3 = arith.cmpi eq, %0, %2 : vector<128x16xi32>
    %4 = arith.extui %3 : vector<128x16xi1> to vector<128x16xi32>
    %5 = arith.sitofp %4 : vector<128x16xi32> to vector<128x16xf32>
    %c0_1 = arith.constant 0 : index
    %c0_2 = arith.constant 0 : index
    %6 = vector.load %arg4[%c0_1, %c0_2] : memref<16x128xf32, #tpu.memory_space<vmem>>, vector<16x128xf32>
    %cst = arith.constant dense<0.000000e+00> : vector<128x128xf32>
    %7 = tpu.matmul %5, %6, %cst {dimension_numbers = #tpu.dot_dimension_numbers<[1], [0], [0], [1], [0, 0, 1, 1], [], []>} : vector<128x16xf32>, vector<16x128xf32>, vector<128x128xf32> -> vector<128x128xf32>
    %c0_3 = arith.constant 0 : index
    %c0_4 = arith.constant 0 : index
    %8 = vector.load %arg2[%c0_3, %c0_4] : memref<128x1xi32, #tpu.memory_space<vmem>>, vector<128x1xi32>
    %9 = vector.broadcast %8 : vector<128x1xi32> to vector<128x16xi32>
    %10 = arith.cmpi eq, %0, %9 : vector<128x16xi32>
    %11 = arith.extui %10 : vector<128x16xi1> to vector<128x16xi32>
    %12 = arith.sitofp %11 : vector<128x16xi32> to vector<128x16xf32>
    %c0_5 = arith.constant 0 : index
    %c0_6 = arith.constant 0 : index
    %13 = vector.load %arg4[%c0_5, %c0_6] : memref<16x128xf32, #tpu.memory_space<vmem>>, vector<16x128xf32>
    %cst_7 = arith.constant dense<0.000000e+00> : vector<128x128xf32>
    %14 = tpu.matmul %12, %13, %cst_7 {dimension_numbers = #tpu.dot_dimension_numbers<[1], [0], [0], [1], [0, 0, 1, 1], [], []>} : vector<128x16xf32>, vector<16x128xf32>, vector<128x128xf32> -> vector<128x128xf32>
    %15 = tpu.iota {dimensions = array<i32: 1>} : vector<128x128xi32>
    %c0_8 = arith.constant 0 : index
    %c0_9 = arith.constant 0 : index
    %16 = vector.load %arg3[%c0_8, %c0_9] : memref<128x1xi32, #tpu.memory_space<vmem>>, vector<128x1xi32>
    %17 = vector.broadcast %16 : vector<128x1xi32> to vector<128x128xi32>
    %18 = arith.cmpi eq, %15, %17 : vector<128x128xi32>
    %19 = arith.extui %18 : vector<128x128xi1> to vector<128x128xi32>
    %20 = arith.sitofp %19 : vector<128x128xi32> to vector<128x128xf32>
    %c0_10 = arith.constant 0 : index
    %c0_11 = arith.constant 0 : index
    %21 = vector.load %arg5[%c0_10, %c0_11] : memref<128x128xf32, #tpu.memory_space<vmem>>, vector<128x128xf32>
    %cst_12 = arith.constant dense<0.000000e+00> : vector<128x128xf32>
    %22 = tpu.matmul %20, %21, %cst_12 {dimension_numbers = #tpu.dot_dimension_numbers<[1], [0], [0], [1], [0, 0, 1, 1], [], []>} : vector<128x128xf32>, vector<128x128xf32>, vector<128x128xf32> -> vector<128x128xf32>
    %c0_13 = arith.constant 0 : index
    %c0_14 = arith.constant 0 : index
    %23 = vector.load %arg6[%c0_13, %c0_14] : memref<128x128xf32, #tpu.memory_space<vmem>>, vector<128x128xf32>
    %cst_15 = arith.constant dense<0.000000e+00> : vector<128x128xf32>
    %24 = tpu.matmul %7, %23, %cst_15 {dimension_numbers = #tpu.dot_dimension_numbers<[1], [0], [0], [1], [0, 0, 1, 1], [], []>} : vector<128x128xf32>, vector<128x128xf32>, vector<128x128xf32> -> vector<128x128xf32>
    %c0_16 = arith.constant 0 : index
    %c0_17 = arith.constant 0 : index
    %25 = vector.load %arg7[%c0_16, %c0_17] : memref<128x128xf32, #tpu.memory_space<vmem>>, vector<128x128xf32>
    %cst_18 = arith.constant dense<0.000000e+00> : vector<128x128xf32>
    %26 = tpu.matmul %22, %25, %cst_18 {dimension_numbers = #tpu.dot_dimension_numbers<[1], [0], [0], [1], [0, 0, 1, 1], [], []>} : vector<128x128xf32>, vector<128x128xf32>, vector<128x128xf32> -> vector<128x128xf32>
    %27 = arith.addf %24, %26 : vector<128x128xf32>
    %c0_19 = arith.constant 0 : index
    %c0_20 = arith.constant 0 : index
    %28 = vector.load %arg8[%c0_19, %c0_20] : memref<1x128xf32, #tpu.memory_space<vmem>>, vector<1x128xf32>
    %29 = vector.broadcast %28 : vector<1x128xf32> to vector<128x128xf32>
    %30 = arith.addf %27, %29 : vector<128x128xf32>
    %31 = math.tanh %30 : vector<128x128xf32>
    %c0_21 = arith.constant 0 : index
    %c0_22 = arith.constant 0 : index
    %32 = vector.load %arg9[%c0_21, %c0_22] : memref<128x128xf32, #tpu.memory_space<vmem>>, vector<128x128xf32>
    %cst_23 = arith.constant dense<0.000000e+00> : vector<128x128xf32>
    %33 = tpu.matmul %14, %32, %cst_23 {dimension_numbers = #tpu.dot_dimension_numbers<[1], [0], [0], [1], [0, 0, 1, 1], [], []>} : vector<128x128xf32>, vector<128x128xf32>, vector<128x128xf32> -> vector<128x128xf32>
    %c0_24 = arith.constant 0 : index
    %c0_25 = arith.constant 0 : index
    %34 = vector.load %arg10[%c0_24, %c0_25] : memref<128x128xf32, #tpu.memory_space<vmem>>, vector<128x128xf32>
    %cst_26 = arith.constant dense<0.000000e+00> : vector<128x128xf32>
    %35 = tpu.matmul %22, %34, %cst_26 {dimension_numbers = #tpu.dot_dimension_numbers<[1], [0], [0], [1], [0, 0, 1, 1], [], []>} : vector<128x128xf32>, vector<128x128xf32>, vector<128x128xf32> -> vector<128x128xf32>
    %36 = arith.addf %33, %35 : vector<128x128xf32>
    %c0_27 = arith.constant 0 : index
    %c0_28 = arith.constant 0 : index
    %37 = vector.load %arg11[%c0_27, %c0_28] : memref<1x128xf32, #tpu.memory_space<vmem>>, vector<1x128xf32>
    %38 = vector.broadcast %37 : vector<1x128xf32> to vector<128x128xf32>
    %39 = arith.addf %36, %38 : vector<128x128xf32>
    %40 = math.tanh %39 : vector<128x128xf32>
    %41 = tpu.iota {dimensions = array<i32: 1>} : vector<128x128xi32>
    %cst_29 = arith.constant 0.000000e+00 : f32
    %42 = vector.broadcast %cst_29 : f32 to vector<128x128xf32>
    %c0_30 = arith.constant 0 : index
    %c0_31 = arith.constant 0 : index
    %43 = vector.load %arg13[%c0_30, %c0_31] : memref<1x128xf32, #tpu.memory_space<vmem>>, vector<1x128xf32>
    %44 = vector.broadcast %43 : vector<1x128xf32> to vector<128x128xf32>
    %45 = arith.addf %42, %44 : vector<128x128xf32>
    %c0_32 = arith.constant 0 : index
    %c0_33 = arith.constant 0 : index
    %c0_34 = arith.constant 0 : index
    %46 = vector.load %arg12[%c0_32, %c0_33, %c0_34] : memref<2x128x128xf32, #tpu.memory_space<vmem>>, vector<1x128x128xf32>
    %47 = vector.shape_cast %46 : vector<1x128x128xf32> to vector<128x128xf32>
    %cst_35 = arith.constant dense<0.000000e+00> : vector<128x128xf32>
    %48 = tpu.matmul %40, %47, %cst_35 {dimension_numbers = #tpu.dot_dimension_numbers<[1], [0], [0], [1], [0, 0, 1, 1], [], []>} : vector<128x128xf32>, vector<128x128xf32>, vector<128x128xf32> -> vector<128x128xf32>
    %49 = arith.mulf %31, %48 : vector<128x128xf32>
    %cst_36 = arith.constant dense<0.000000e+00> : vector<128xf32>
    %50 = vector.multi_reduction <add>, %49, %cst_36 [1] : vector<128x128xf32> to vector<128xf32>
    %51 = vector.shape_cast %50 : vector<128xf32> to vector<128x1xf32>
    %c0_i32 = arith.constant 0 : i32
    %52 = vector.broadcast %c0_i32 : i32 to vector<128x128xi32>
    %53 = arith.cmpi eq, %41, %52 : vector<128x128xi32>
    %cst_37 = arith.constant 0.000000e+00 : f32
    %54 = vector.shape_cast %51 : vector<128x1xf32> to vector<128x1xf32>
    %55 = vector.broadcast %54 : vector<128x1xf32> to vector<128x128xf32>
    %56 = vector.broadcast %cst_37 : f32 to vector<128x128xf32>
    %57 = arith.select %53, %55, %56 : vector<128x128xi1>, vector<128x128xf32>
    %58 = arith.addf %45, %57 : vector<128x128xf32>
    %c1 = arith.constant 1 : index
    %c0_38 = arith.constant 0 : index
    %c0_39 = arith.constant 0 : index
    %59 = vector.load %arg12[%c1, %c0_38, %c0_39] : memref<2x128x128xf32, #tpu.memory_space<vmem>>, vector<1x128x128xf32>
    %60 = vector.shape_cast %59 : vector<1x128x128xf32> to vector<128x128xf32>
    %cst_40 = arith.constant dense<0.000000e+00> : vector<128x128xf32>
    %61 = tpu.matmul %40, %60, %cst_40 {dimension_numbers = #tpu.dot_dimension_numbers<[1], [0], [0], [1], [0, 0, 1, 1], [], []>} : vector<128x128xf32>, vector<128x128xf32>, vector<128x128xf32> -> vector<128x128xf32>
    %62 = arith.mulf %31, %61 : vector<128x128xf32>
    %cst_41 = arith.constant dense<0.000000e+00> : vector<128xf32>
    %63 = vector.multi_reduction <add>, %62, %cst_41 [1] : vector<128x128xf32> to vector<128xf32>
    %64 = vector.shape_cast %63 : vector<128xf32> to vector<128x1xf32>
    %c1_i32 = arith.constant 1 : i32
    %65 = vector.broadcast %c1_i32 : i32 to vector<128x128xi32>
    %66 = arith.cmpi eq, %41, %65 : vector<128x128xi32>
    %cst_42 = arith.constant 0.000000e+00 : f32
    %67 = vector.shape_cast %64 : vector<128x1xf32> to vector<128x1xf32>
    %68 = vector.broadcast %67 : vector<128x1xf32> to vector<128x128xf32>
    %69 = vector.broadcast %cst_42 : f32 to vector<128x128xf32>
    %70 = arith.select %66, %68, %69 : vector<128x128xi1>, vector<128x128xf32>
    %71 = arith.addf %58, %70 : vector<128x128xf32>
    %c0_43 = arith.constant 0 : index
    %c0_44 = arith.constant 0 : index
    %72 = vector.load %arg14[%c0_43, %c0_44] : memref<128x128xf32, #tpu.memory_space<vmem>>, vector<128x128xf32>
    tpu.vector_store %arg14[%c0_43, %c0_44], %71 {strides = array<i32>} : memref<128x128xf32, #tpu.memory_space<vmem>>, vector<128x128xf32>,
    return
  }
  func.func @transform_0(%arg0: i32) -> (i32, i32) {
    %c0_i32 = arith.constant 0 : i32
    %c0_i32_0 = arith.constant 0 : i32
    return %arg0, %c0_i32 : i32, i32
  }
  func.func @transform_1(%arg0: i32) -> (i32, i32) {
    %c0_i32 = arith.constant 0 : i32
    %c0_i32_0 = arith.constant 0 : i32
    return %arg0, %c0_i32 : i32, i32
  }
  func.func @transform_2(%arg0: i32) -> (i32, i32) {
    %c0_i32 = arith.constant 0 : i32
    %c0_i32_0 = arith.constant 0 : i32
    return %arg0, %c0_i32 : i32, i32
  }
  func.func @transform_3(%arg0: i32) -> (i32, i32) {
    %c0_i32 = arith.constant 0 : i32
    %c0_i32_0 = arith.constant 0 : i32
    %c0_i32_1 = arith.constant 0 : i32
    return %c0_i32, %c0_i32_0 : i32, i32
  }
  func.func @transform_4(%arg0: i32) -> (i32, i32) {
    %c0_i32 = arith.constant 0 : i32
    %c0_i32_0 = arith.constant 0 : i32
    %c0_i32_1 = arith.constant 0 : i32
    return %c0_i32, %c0_i32_0 : i32, i32
  }
  func.func @transform_5(%arg0: i32) -> (i32, i32) {
    %c0_i32 = arith.constant 0 : i32
    %c0_i32_0 = arith.constant 0 : i32
    %c0_i32_1 = arith.constant 0 : i32
    return %c0_i32, %c0_i32_0 : i32, i32
  }
  func.func @transform_6(%arg0: i32) -> (i32, i32) {
    %c0_i32 = arith.constant 0 : i32
    %c0_i32_0 = arith.constant 0 : i32
    %c0_i32_1 = arith.constant 0 : i32
    return %c0_i32, %c0_i32_0 : i32, i32
  }
  func.func @transform_7(%arg0: i32) -> (i32, i32) {
    %c0_i32 = arith.constant 0 : i32
    %c0_i32_0 = arith.constant 0 : i32
    %c0_i32_1 = arith.constant 0 : i32
    return %c0_i32, %c0_i32_0 : i32, i32
  }
  func.func @transform_8(%arg0: i32) -> (i32, i32) {
    %c0_i32 = arith.constant 0 : i32
    %c0_i32_0 = arith.constant 0 : i32
    %c0_i32_1 = arith.constant 0 : i32
    return %c0_i32, %c0_i32_0 : i32, i32
  }
  func.func @transform_9(%arg0: i32) -> (i32, i32) {
    %c0_i32 = arith.constant 0 : i32
    %c0_i32_0 = arith.constant 0 : i32
    %c0_i32_1 = arith.constant 0 : i32
    return %c0_i32, %c0_i32_0 : i32, i32
  }
  func.func @transform_10(%arg0: i32) -> (i32, i32) {
    %c0_i32 = arith.constant 0 : i32
    %c0_i32_0 = arith.constant 0 : i32
    %c0_i32_1 = arith.constant 0 : i32
    return %c0_i32, %c0_i32_0 : i32, i32
  }
  func.func @transform_11(%arg0: i32) -> (i32, i32, i32) {
    %c0_i32 = arith.constant 0 : i32
    %c0_i32_0 = arith.constant 0 : i32
    %c0_i32_1 = arith.constant 0 : i32
    %c0_i32_2 = arith.constant 0 : i32
    return %c0_i32, %c0_i32_0, %c0_i32_1 : i32, i32, i32
  }
  func.func @transform_12(%arg0: i32) -> (i32, i32) {
    %c0_i32 = arith.constant 0 : i32
    %c0_i32_0 = arith.constant 0 : i32
    %c0_i32_1 = arith.constant 0 : i32
    return %c0_i32, %c0_i32_0 : i32, i32
  }
  func.func @transform_13(%arg0: i32) -> (i32, i32) {
    %c0_i32 = arith.constant 0 : i32
    %c0_i32_0 = arith.constant 0 : i32
    return %arg0, %c0_i32 : i32, i32
  }
}

</mosaic_0001>

<bundles_post_ra>
// kernel: forward_main.2
= control target key start
LH: loop header
LB: loop body
LE: loop exit
PB: predicated region body
PF: predicated region fallthrough
CT: control target
= control target key end

     0   :  { %s1044_s12 = smov 0   ;;  %s1338_s0 = inlined_call_operand.vmem [shape: f32[2,4,8,128], index: 0, kind: input, shape index: {}]   ;;  %s1339_s1 = inlined_call_operand.vmem [shape: f32[2,128,128], index: 1, kind: input, shape index: {}]   ;;  %s1340_s2 = inlined_call_operand.vmem [shape: f32[1,128], index: 2, kind: input, shape index: {}]   ;;  %s1341_s3 = inlined_call_operand.vmem [shape: f32[128,128], index: 3, kind: output, shape index: {}]  }
   0x1 LB: > { %s1050_s13 = sadd.s32 4294967295, %s1021_s12   ;;  %p871_p0 = scmp.ge.s32.totalorder %s1021_s12, 1  ;;  %s1021_s12 = sphi %s1044_s12, %s13_s12  }
   0x2   : > { %p147_p1 = scmp.lt.s32.totalorder %s1021_s12, 3 }
   0x4   : > { %p148_p2 = pnand %p871_p0, %p147_p1 }
   0x5   : > { %p176_p3 = scmp.lt.s32.totalorder (!%p148_p2), %s1050_s13, 1  ;;  %s876_s23 = sshll.u32 (!%p148_p2), %s1050_s13, 3 }
   0x6   : > { %151 = sbr.rel (%p148_p2) target bundleno = 413 (0x19d), region = 32  ;;  %p187_p4 = scmp.lt.s32.totalorder (!%p148_p2), %s876_s23, 15 }
   0xb   : > { %v198_v0 = vlaneseq  ;;  %v1023_v1 = vmov 1966171168   ;;  %s177_s14 = scalar_select %p176_p3, %s1050_s13, 1 }
   0xc   : > { %v196_v2 = vunpack.c.l.s4 %v1023_v1  ;;  %s1343_s23 = smov (!%p187_p4, %s876_s23), 15 }
   0xd   : > { %v199_v3 = vshrl.u32 %v198_v0, 7  ;;  %s884_s15 = sshll.u32 %s177_s14, 5  ;;  %s885_s16 = sshll.u32 %s177_s14, 7 }
   0xe   : > { %v197_v4 = vunpack.c.0.s8 %v196_v2  ;;  %s180_s19 = scalar_lea.vmem %s1338_s0, %s884_s15  ;;  %s1062_s22 = scalar_lea.vmem %s1339_s1, %s885_s16 }
   0xf   : > { %v1066_v6 = vld [vmem:[%s180_s19] sm:$0xff]  ;;  %v1068_v7 = vsub.s32 0, %v199_v3  ;;  %v1070_v8 = vld [vmem:[%s180_s19 + $0x8] sm:$0xff]  ;;  %v1072_v9 = vld [vmem:[%s180_s19 + $0x10] sm:$0xff]  ;;  %s877_s24 = sshll.u32 %s1343_s23, 3 }
  0x10   : > { %v1064_v5 = vsub.s32 %v197_v4, %v199_v3  ;;  %v1080_v13 = vld [vmem:[%s180_s19 + $0x18] sm:$0xff]  ;;  %v194_v14 = vcombine.high %v1066_v6, %v1066_v6  ;;  %v677_v16 = vld [vmem:[%s1062_s22 + $0x70] sm:$0xff]  ;;  %v302_v18 = vcombine.high %v1070_v8, %v1070_v8  ;;  %v410_v19 = vcombine.high %v1072_v9, %v1072_v9  ;;  %v1107_v29 = vld [vmem:[%s1062_s22 + $0x68] sm:$0xff]  ;;  %s190_s29 = scalar_lea.vmem %s1341_s3, %s877_s24 }
  0x11   : > { %v678_v15 = vld [vmem:[%s1062_s22 + $0x78] sm:$0xff]  ;;  %v518_v20 = vcombine.high %v1080_v13, %v1080_v13  ;;  %v1143_v46 = vld [vmem:[%s1062_s22 + $0x60] sm:$0xff] }
  0x12   : > { %v201_v10 = vrot.slane %v1066_v6, %v1064_v5  ;;  %v309_v11 = vrot.slane %v1070_v8, %v1064_v5  ;;  %v417_v12 = vrot.slane %v1072_v9, %v1064_v5  ;;  %v525_v17 = vrot.slane %v1080_v13, %v1064_v5  ;;  %910 = vmatprep.subr.mxu0 %v678_v15  ;;  %v1175_v3 = vld [vmem:[%s1062_s22 + $0x58] sm:$0xff] }
  0x13   : > { %911 = vmatpush3.msra.mxu0 %v678_v15  ;;  %954 = vmatprep.subr.mxu1 %v678_v15  ;;  %v208_v49 = vrot.slane %v194_v14, %v1064_v5  ;;  %v316_v50 = vrot.slane %v302_v18, %v1064_v5  ;;  %v424_v54 = vrot.slane %v410_v19, %v1064_v5 }
  0x14   : > { %v1095_v21 = vrot.slane %v201_v10, %v1064_v5  ;;  %v1098_v22 = vrot.slane %v309_v11, %v1064_v5  ;;  %v1101_v23 = vrot.slane %v417_v12, %v1064_v5  ;;  %v209_v24 = vcombine.high %v201_v10, %v201_v10  ;;  %912 = vmatprep.subr.mxu0 %v677_v16 }
  0x15   : > { %v1104_v25 = vrot.slane %v525_v17, %v1064_v5  ;;  %v317_v26 = vcombine.high %v309_v11, %v309_v11  ;;  %v425_v27 = vcombine.high %v417_v12, %v417_v12  ;;  %v533_v28 = vcombine.high %v525_v17, %v525_v17  ;;  %913 = vmatpush3.msra.mxu0 %v677_v16 }
  0x16   : > { %v246_v30 = vrot.slane %v1095_v21, %v1068_v7  ;;  %v354_v31 = vrot.slane %v1098_v22, %v1068_v7  ;;  %v462_v32 = vrot.slane %v1101_v23, %v1068_v7  ;;  %v1116_v33 = vrot.slane %v209_v24, %v1064_v5  ;;  %914 = vmatprep.subr.mxu0 %v1107_v29 }
  0x17   : > { %v570_v34 = vrot.slane %v1104_v25, %v1068_v7  ;;  %v1121_v35 = vrot.slane %v317_v26, %v1064_v5  ;;  %v1124_v36 = vrot.slane %v425_v27, %v1064_v5  ;;  %v1127_v37 = vrot.slane %v533_v28, %v1064_v5  ;;  %970 = vmatpush3.msra.mxu1 %v678_v15 }
  0x18   : > { %v283_v38 = vmul.f32 %v246_v30, %v1066_v6  ;;  %v391_v39 = vmul.f32 %v1070_v8, %v354_v31  ;;  %v499_v40 = vmul.f32 %v1072_v9, %v462_v32  ;;  %v250_v41 = vrot.slane %v1116_v33, %v1068_v7  ;;  %915 = vmatpush3.msra.mxu0 %v1107_v29 }
  0x19   : > { %v607_v42 = vmul.f32 %v1080_v13, %v570_v34  ;;  %v358_v43 = vrot.slane %v1121_v35, %v1068_v7  ;;  %v466_v44 = vrot.slane %v1124_v36, %v1068_v7  ;;  %v574_v45 = vrot.slane %v1127_v37, %v1068_v7  ;;  %955 = vmatprep.subr.mxu1 %v677_v16 }
  0x1a   : > { %v399_v47 = vadd.f32 %v391_v39, %v283_v38  ;;  %v284_v48 = vmul.f32 %v250_v41, %v1066_v6  ;;  %v1154_v56 = vrot.slane %v208_v49, %v1064_v5  ;;  %v1157_v57 = vrot.slane %v316_v50, %v1064_v5  ;;  %916 = vmatprep.subr.mxu0 %v1143_v46  ;;  %v1212_v39 = vld [vmem:[%s1062_s22 + $0x50] sm:$0xff] }
  0x1b   : > { %v392_v51 = vmul.f32 %v1070_v8, %v358_v43  ;;  %v500_v52 = vmul.f32 %v1072_v9, %v466_v44  ;;  %v608_v53 = vmul.f32 %v1080_v13, %v574_v45  ;;  %v532_v58 = vrot.slane %v518_v20, %v1064_v5  ;;  %971 = vmatpush3.msra.mxu1 %v677_v16 }
  0x1c   : > { %v507_v55 = vadd.f32 %v499_v40, %v399_v47  ;;  %v1162_v60 = vrot.slane %v424_v54, %v1064_v5  ;;  %v210_v61 = vcombine.high %v208_v49, %v208_v49  ;;  %v318_v62 = vcombine.high %v316_v50, %v316_v50  ;;  %917 = vmatpush3.msra.mxu0 %v1143_v46 }
  0x1d   : > { %v400_v59 = vadd.f32 %v392_v51, %v284_v48  ;;  %v262_v0 = vrot.slane %v1154_v56, %v1068_v7  ;;  %v370_v1 = vrot.slane %v1157_v57, %v1068_v7  ;;  %v1171_v2 = vrot.slane %v532_v58, %v1064_v5  ;;  %956 = vmatprep.subr.mxu1 %v1107_v29 }
  0x1e   : > { %v1164_v63 = vadd.f32 %v607_v42, %v507_v55  ;;  %v478_v10 = vrot.slane %v1162_v60, %v1068_v7  ;;  %v1180_v11 = vrot.slane %v210_v61, %v1064_v5  ;;  %v1183_v12 = vrot.slane %v318_v62, %v1064_v5  ;;  %918 = vmatprep.subr.mxu0 %v1175_v3 }
  0x1f   : > { %v508_v4 = vadd.f32 %v500_v52, %v400_v59  ;;  %v287_v14 = vmul.f32 %v262_v0, %v1066_v6  ;;  %v395_v15 = vmul.f32 %v1070_v8, %v370_v1  ;;  %v586_v16 = vrot.slane %v1171_v2, %v1068_v7  ;;  %972 = vmatpush3.msra.mxu1 %v1107_v29 }
  0x20   : > { %623 = vadd.xlane.f32.xlu0 %v1164_v63  ;;  %v426_v17 = vcombine.high %v424_v54, %v424_v54  ;;  %v503_v19 = vmul.f32 %v1072_v9, %v478_v10  ;;  %v266_v20 = vrot.slane %v1180_v11, %v1068_v7  ;;  %v374_v24 = vrot.slane %v1183_v12, %v1068_v7 }
  0x21   : > { %v1191_v18 = vadd.f32 %v608_v53, %v508_v4  ;;  %v403_v26 = vadd.f32 %v395_v15, %v287_v14  ;;  %v611_v27 = vmul.f32 %v1080_v13, %v586_v16  ;;  %v534_v30 = vcombine.high %v532_v58, %v532_v58  ;;  %919 = vmatpush3.msra.mxu0 %v1175_v3  ;;  %v672_v15 = vld [vmem:[%s1062_s22 + $0x48] sm:$0xff] }
  0x22   : > { %v1201_v28 = vrot.slane %v426_v17, %v1064_v5  ;;  %v288_v31 = vmul.f32 %v266_v20, %v1066_v6  ;;  %v396_v32 = vmul.f32 %v1070_v8, %v374_v24  ;;  %v239_v34 = vcombine.high %v1095_v21, %v1095_v21  ;;  %957 = vmatprep.subr.mxu1 %v1143_v46 }
  0x23   : > { %625 = vadd.xlane.f32.xlu1 %v1191_v18  ;;  %v347_v38 = vcombine.high %v1098_v22, %v1098_v22  ;;  %v511_v40 = vadd.f32 %v503_v19, %v403_v26  ;;  %v1217_v29 = vrot.slane %v534_v30, %v1064_v5  ;;  %v455_v42 = vcombine.high %v1101_v23, %v1101_v23 }
  0x24   : > { %v482_v41 = vrot.slane %v1201_v28, %v1068_v7  ;;  %v404_v43 = vadd.f32 %v396_v32, %v288_v31  ;;  %v254_v21 = vrot.slane %v239_v34, %v1068_v7  ;;  %v563_v22 = vcombine.high %v1104_v25, %v1104_v25  ;;  %920 = vmatprep.subr.mxu0 %v1212_v39  ;;  %v671_v31 = vld [vmem:[%s1062_s22 + $0x40] sm:$0xff] }
  0x25   : > { %v362_v44 = vrot.slane %v347_v38, %v1068_v7  ;;  %v1227_v45 = vadd.f32 %v611_v27, %v511_v40  ;;  %v590_v47 = vrot.slane %v1217_v29, %v1068_v7  ;;  %v470_v23 = vrot.slane %v455_v42, %v1068_v7  ;;  %973 = vmatpush3.msra.mxu1 %v1143_v46 }
  0x26   : > { %v504_v5 = vmul.f32 %v1072_v9, %v482_v41  ;;  %v285_v48 = vmul.f32 %v254_v21, %v1066_v6  ;;  %v578_v50 = vrot.slane %v563_v22, %v1068_v7  ;;  %v240_v25 = vcombine.high %v1154_v56, %v1154_v56  ;;  %921 = vmatpush3.msra.mxu0 %v1212_v39 }
  0x27   : > { %v393_v49 = vmul.f32 %v1070_v8, %v362_v44  ;;  %631 = vadd.xlane.f32.xlu0 %v1227_v45  ;;  %v612_v52 = vmul.f32 %v1080_v13, %v590_v47  ;;  %v501_v53 = vmul.f32 %v1072_v9, %v470_v23  ;;  %v348_v54 = vcombine.high %v1157_v57, %v1157_v57  ;;  %v670_v47 = vld [vmem:[%s1062_s22 + $0x38] sm:$0xff] }
  0x28   : > { %v512_v51 = vadd.f32 %v504_v5, %v404_v43  ;;  %v609_v58 = vmul.f32 %v1080_v13, %v578_v50  ;;  %v270_v59 = vrot.slane %v240_v25, %v1068_v7  ;;  %v456_v56 = vcombine.high %v1162_v60, %v1162_v60  ;;  %958 = vmatprep.subr.mxu1 %v1175_v3  ;;  %v665_v50 = vld [vmem:[%s1062_s22 + $0x10] sm:$0xff]  ;;  %v664_v25 = vld [vmem:[%s1062_s22 + $0x8] sm:$0xff] }
  0x29   : > { %v401_v55 = vadd.f32 %v393_v49, %v285_v48  ;;  %v378_v61 = vrot.slane %v348_v54, %v1068_v7  ;;  %v564_v62 = vcombine.high %v1171_v2, %v1171_v2  ;;  %v241_v57 = vcombine.high %v1116_v33, %v1116_v33  ;;  %974 = vmatpush3.msra.mxu1 %v1175_v3  ;;  %v666_v49 = vld [vmem:[%s1062_s22 + $0x18] sm:$0xff] }
  0x2a   : > { %v1250_v46 = vadd.f32 %v612_v52, %v512_v51  ;;  %v289_v1 = vmul.f32 %v270_v59, %v1066_v6  ;;  %v486_v60 = vrot.slane %v456_v56, %v1068_v7  ;;  %v349_v4 = vcombine.high %v1121_v35, %v1121_v35  ;;  %922 = vmatprep.subr.mxu0 %v672_v15  ;;  %v663_v51 = vld [vmem:[%s1062_s22] sm:$0xff] }
  0x2b   : > { %v509_v0 = vadd.f32 %v501_v53, %v401_v55  ;;  %v397_v10 = vmul.f32 %v1070_v8, %v378_v61  ;;  %v594_v2 = vrot.slane %v564_v62, %v1068_v7  ;;  %v258_v33 = vrot.slane %v241_v57, %v1068_v7  ;;  %923 = vmatpush3.msra.mxu0 %v672_v15 }
  0x2c   : > { %633 = vadd.xlane.f32.xlu1 %v1250_v46  ;;  %v457_v14 = vcombine.high %v1124_v36, %v1124_v36  ;;  %v505_v17 = vmul.f32 %v1072_v9, %v486_v60  ;;  %v366_v35 = vrot.slane %v349_v4, %v1068_v7  ;;  %v565_v3 = vcombine.high %v1127_v37, %v1127_v37 }
  0x2d   : > { %v1270_v16 = vadd.f32 %v609_v58, %v509_v0  ;;  %v405_v19 = vadd.f32 %v397_v10, %v289_v1  ;;  %v613_v20 = vmul.f32 %v1080_v13, %v594_v2  ;;  %v286_v24 = vmul.f32 %v258_v33, %v1066_v6  ;;  %959 = vmatprep.subr.mxu1 %v1212_v39 }
  0x2e   : > { %v474_v26 = vrot.slane %v457_v14, %v1068_v7  ;;  %v394_v36 = vmul.f32 %v1070_v8, %v366_v35  ;;  %v582_v27 = vrot.slane %v565_v3, %v1068_v7  ;;  %v242_v30 = vcombine.high %v1180_v11, %v1180_v11  ;;  %924 = vmatprep.subr.mxu0 %v671_v31 }
  0x2f   : > { %627 = vadd.xlane.f32.xlu0 %v1270_v16  ;;  %v350_v37 = vcombine.high %v1183_v12, %v1183_v12  ;;  %v513_v32 = vadd.f32 %v505_v17, %v405_v19  ;;  %v458_v38 = vcombine.high %v1201_v28, %v1201_v28  ;;  %v566_v40 = vcombine.high %v1217_v29, %v1217_v29 }
  0x30   : > { %v502_v34 = vmul.f32 %v1072_v9, %v474_v26  ;;  %v402_v41 = vadd.f32 %v394_v36, %v286_v24  ;;  %v610_v42 = vmul.f32 %v1080_v13, %v582_v27  ;;  %v274_v11 = vrot.slane %v242_v30, %v1068_v7  ;;  %975 = vmatpush3.msra.mxu1 %v1212_v39  ;;  %v667_v39 = vld [vmem:[%s1062_s22 + $0x20] sm:$0xff] }
  0x31   : > { %v382_v12 = vrot.slane %v350_v37, %v1068_v7  ;;  %v1296_v43 = vadd.f32 %v613_v20, %v513_v32  ;;  %v490_v21 = vrot.slane %v458_v38, %v1068_v7  ;;  %v598_v28 = vrot.slane %v566_v40, %v1068_v7  ;;  %925 = vmatpush3.msra.mxu0 %v671_v31 }
  0x32   : > { %v510_v29 = vadd.f32 %v502_v34, %v402_v41  ;;  %v290_v44 = vmul.f32 %v274_v11, %v1066_v6  ;;  %960 = vmatprep.subr.mxu1 %v672_v15  ;;  %926 = vmatprep.subr.mxu0 %v670_v47 }
  0x33   : > { %v398_v22 = vmul.f32 %v1070_v8, %v382_v12  ;;  %635 = vadd.xlane.f32.xlu1 %v1296_v43  ;;  %v506_v5 = vmul.f32 %v1072_v9, %v490_v21  ;;  %976 = vmatpush3.msra.mxu1 %v672_v15  ;;  %v614_v7 = vmul.f32 %v1080_v13, %v598_v28  ;;  %v669_v8 = vld [vmem:[%s1062_s22 + $0x30] sm:$0xff]  ;;  %v668_v13 = vld [vmem:[%s1062_s22 + $0x28] sm:$0xff] }
  0x34   : > { %v1306_v23 = vadd.f32 %v610_v42, %v510_v29  ;;  %961 = vmatprep.subr.mxu1 %v671_v31  ;;  %927 = vmatpush3.msra.mxu0 %v670_v47 }
  0x35   : > { %v406_v48 = vadd.f32 %v398_v22, %v290_v44  ;;  %977 = vmatpush3.msra.mxu1 %v671_v31  ;;  %928 = vmatprep.subr.mxu0 %v669_v8 }
  0x36   : > { %629 = vadd.xlane.f32.xlu0 %v1306_v23  ;;  %962 = vmatprep.subr.mxu1 %v670_v47 }
  0x37   : > { %v514_v6 = vadd.f32 %v506_v5, %v406_v48  ;;  %978 = vmatpush3.msra.mxu1 %v670_v47  ;;  %929 = vmatpush3.msra.mxu0 %v669_v8 }
  0x38   : > { %963 = vmatprep.subr.mxu1 %v669_v8  ;;  %930 = vmatprep.subr.mxu0 %v668_v13 }
  0x39   : > { %v1311_v9 = vadd.f32 %v614_v7, %v514_v6  ;;  %979 = vmatpush3.msra.mxu1 %v669_v8  ;;  %931 = vmatpush3.msra.mxu0 %v668_v13 }
  0x3a   : > { %964 = vmatprep.subr.mxu1 %v668_v13  ;;  %932 = vmatprep.subr.mxu0 %v667_v39 }
  0x3b   : > { %637 = vadd.xlane.f32.xlu1 %v1311_v9  ;;  %980 = vmatpush3.msra.mxu1 %v668_v13 }
  0x3c   : > { %965 = vmatprep.subr.mxu1 %v667_v39  ;;  %933 = vmatpush3.msra.mxu0 %v667_v39 }
  0x3d   : > { %981 = vmatpush3.msra.mxu1 %v667_v39  ;;  %934 = vmatprep.subr.mxu0 %v666_v49 }
  0x3e   : > { %966 = vmatprep.subr.mxu1 %v666_v49  ;;  %935 = vmatpush3.msra.mxu0 %v666_v49 }
  0x3f   : > { %982 = vmatpush3.msra.mxu1 %v666_v49  ;;  %936 = vmatprep.subr.mxu0 %v665_v50 }
  0x40   : > { %967 = vmatprep.subr.mxu1 %v665_v50  ;;  %937 = vmatpush3.msra.mxu0 %v665_v50 }
  0x41   : > { %983 = vmatpush3.msra.mxu1 %v665_v50  ;;  %938 = vmatprep.subr.mxu0 %v664_v25 }
  0x42   : > { %968 = vmatprep.subr.mxu1 %v664_v25  ;;  %939 = vmatpush3.msra.mxu0 %v664_v25 }
  0x43   : > { %984 = vmatpush3.msra.mxu1 %v664_v25  ;;  %940 = vmatprep.subr.mxu0 %v663_v51 }
  0x44   : > { %969 = vmatprep.subr.mxu1 %v663_v51  ;;  %941 = vmatpush3.msra.mxu0 %v663_v51 }
  0x45   : > { %985 = vmatpush3.msra.mxu1 %v663_v51 }
  0xa9   : > { %v624_v52 = vpop.xlane.xlu0 %623 }
  0xaa   : > { %v639_v53 = vadd.f32 4e-05, %v624_v52 }
  0xac   : > { %999 = vrcp.f32 %v639_v53  ;;  %v626_v54 = vpop.xlane.xlu1 %625 }
  0xad   : > { %v640_v55 = vadd.f32 4e-05, %v626_v54 }
  0xaf   : > { %1001 = vrcp.f32 %v640_v55 }
  0xb0   : > { %v632_v58 = vpop.xlane.xlu0 %631 }
  0xb1   : > { %v643_v59 = vadd.f32 4e-05, %v632_v58 }
  0xb3   : > { %1003 = vrcp.f32 %v643_v59 }
  0xb5   : > { %v634_v56 = vpop.xlane.xlu1 %633 }
  0xb6   : > { %v644_v61 = vadd.f32 4e-05, %v634_v56 }
  0xb8   : > { %1005 = vrcp.f32 %v644_v61  ;;  %v628_v62 = vpop.xlane.xlu0 %627 }
  0xb9   : > { %v1000_v57 = vpop.eup %999  ;;  %v641_v0 = vadd.f32 4e-05, %v628_v62 }
  0xba   : > { %v655_v1 = vmul.f32 %v1000_v57, %v1164_v63 }
  0xbb   : > { %1007 = vrcp.f32 %v641_v0 }
  0xbc   : > { %v1002_v60 = vpop.eup %1001  ;;  %942 = vmatprep.mubr.f32.mxu0 %v655_v1  ;;  %v636_v4 = vpop.xlane.xlu1 %635 }
  0xbd   : > { %v656_v10 = vmul.f32 %v1002_v60, %v1191_v18  ;;  %v645_v2 = vadd.f32 4e-05, %v636_v4 }
  0xbf   : > { %943 = vmatmul.mubr.f32.vlgmr.msra.gmra.mxu0 %v656_v10  ;;  %1009 = vrcp.f32 %v645_v2  ;;  %v630_v33 = vpop.xlane.xlu0 %629 }
  0xc0   : > { %v1004_v14 = vpop.eup %1003  ;;  %v642_v15 = vadd.f32 4e-05, %v630_v33 }
  0xc1   : > { %v659_v17 = vmul.f32 %v1004_v14, %v1227_v45 }
  0xc2   : > { %1011 = vrcp.f32 %v642_v15 }
  0xc3   : > { %948 = vmatprep.mubr.f32.mxu1 %v659_v17 }
  0xc4   : > { %v638_v35 = vpop.xlane.xlu1 %637 }
  0xc5   : > { %v1006_v3 = vpop.eup %1005  ;;  %v646_v19 = vadd.f32 4e-05, %v638_v35 }
  0xc6   : > { %v660_v63 = vmul.f32 %v1006_v3, %v1250_v46  ;;  %v881_v46 = vld [vmem:[%s1340_s2] ss:$0 sm:$0xff] }
  0xc7   : > { %1013 = vrcp.f32 %v646_v19 }
  0xc8   : > { %v1008_v20 = vpop.eup %1007  ;;  %949 = vmatmul.mubr.f32.vlgmr.msra.gmra.mxu1 %v660_v63 }
  0xc9   : > { %v657_v18 = vmul.f32 %v1008_v20, %v1270_v16 }
  0xcb   : > { %945 = vmatprep.mubr.f32.mxu0 %v657_v18 }
  0xcc   : > { %v1010_v24 = vpop.eup %1009 }
  0xcd   : > { %v661_v26 = vmul.f32 %v1010_v24, %v1296_v43 }
  0xcf   : > { %v1012_v36 = vpop.eup %1011  ;;  %951 = vmatprep.mubr.f32.mxu1 %v661_v26 }
  0xd0   : > { %v658_v45 = vmul.f32 %v1012_v36, %v1306_v23 }
  0xd2   : > { %946 = vmatmul.mubr.f32.gmra.mxu0 %v658_v45 }
  0xd4   : > { %v1014_v27 = vpop.eup %1013 }
  0xd5   : > { %v662_v30 = vmul.f32 %v1014_v27, %v1311_v9 }
  0xd7   : > { %952 = vmatmul.mubr.f32.gmra.mxu1 %v662_v30 }
 0x17f   : > { %v944_v16 = vpop.f32.mrf.mxu0 }
 0x180   : > { %v758_v37 = vadd.f32 %v944_v16, %v881_v46 }
 0x181   : > { %v752_v31 = vpop.f32.mrf.mxu0 }
 0x182   : > { %792 = vst [vmem:[%s190_s29 + $0x8] sm:$0xff] %v758_v37  ;;  %v753_v32 = vadd.f32 %v881_v46, %v752_v31 }
 0x184   : > { %791 = vst [vmem:[%s190_s29] sm:$0xff] %v753_v32 }
 0x188   : > { %v950_v34 = vpop.f32.mrf.mxu1 }
 0x189   : > { %v778_v38 = vadd.f32 %v950_v34, %v881_v46 }
 0x18a   : > { %v772_v40 = vpop.f32.mrf.mxu1 }
 0x18b   : > { %796 = vst [vmem:[%s190_s29 + $0x28] sm:$0xff] %v778_v38  ;;  %v773_v41 = vadd.f32 %v881_v46, %v772_v40 }
 0x18d   : > { %795 = vst [vmem:[%s190_s29 + $0x20] sm:$0xff] %v773_v41 }
 0x192   : > { %v947_v42 = vpop.f32.mrf.mxu0 }
 0x193   : > { %v768_v11 = vadd.f32 %v947_v42, %v881_v46 }
 0x194   : > { %v762_v12 = vpop.f32.mrf.mxu0 }
 0x195   : > { %794 = vst [vmem:[%s190_s29 + $0x18] sm:$0xff] %v768_v11  ;;  %v763_v43 = vadd.f32 %v881_v46, %v762_v12 }
 0x197   : > { %v953_v21 = vpop.f32.mrf.mxu1  ;;  %793 = vst [vmem:[%s190_s29 + $0x10] sm:$0xff] %v763_v43 }
 0x198   : > { %v788_v28 = vadd.f32 %v953_v21, %v881_v46 }
 0x199   : > { %v782_v29 = vpop.f32.mrf.mxu1 }
 0x19a   : > { %798 = vst [vmem:[%s190_s29 + $0x38] sm:$0xff] %v788_v28  ;;  %v783_v44 = vadd.f32 %v881_v46, %v782_v29 }
 0x19c   : > { %797 = vst [vmem:[%s190_s29 + $0x30] sm:$0xff] %v783_v44 }
 0x19d PF: > { %s13_s12 = sadd.s32 1, %s1021_s12  }
 0x19e   : > { %p10_p5 = scmp.ge.s32.totalorder %s13_s12, 4  }
 0x1a0   :  { %12 = sbr.rel (!%p10_p5) target bundleno = 1 (0x1), region = 68 }

// kernel: forward_main.3
= control target key start
LH: loop header
LB: loop body
LE: loop exit
PB: predicated region body
PF: predicated region fallthrough
CT: control target
= control target key end

     0   :  { %v3091_v0 = vmov 0   ;;  %v44_v52 = vlaneseq  ;;  %vm160_vm0 = vcmask 130048   ;;  %v3092_v56 = vmov 0.0   ;;  %s4157_s0 = inlined_call_operand.vmem [shape: s32[128,1], index: 0, kind: input, shape index: {}]   ;;  %s4158_s3 = inlined_call_operand.vmem [shape: f32[16,128], index: 3, kind: input, shape index: {}]   ;;  %s4159_s4 = inlined_call_operand.vmem [shape: f32[128,128], index: 4, kind: input, shape index: {}]   ;;  %s4160_s2 = inlined_call_operand.vmem [shape: s32[128,1], index: 2, kind: input, shape index: {}]   ;;  %s4161_s1 = inlined_call_operand.vmem [shape: s32[128,1], index: 1, kind: input, shape index: {}]   ;;  %s4162_s5 = inlined_call_operand.vmem [shape: f32[128,128], index: 5, kind: input, shape index: {}]   ;;  %s4163_s6 = inlined_call_operand.vmem [shape: f32[128,128], index: 6, kind: input, shape index: {}]   ;;  %s4164_s8 = inlined_call_operand.vmem [shape: f32[128,128], index: 8, kind: input, shape index: {}]   ;;  %s4165_s9 = inlined_call_operand.vmem [shape: f32[128,128], index: 9, kind: input, shape index: {}]   ;;  %s4166_s11 = inlined_call_operand.vmem [shape: f32[2,128,128], index: 11, kind: input, shape index: {}]   ;;  %s4167_s10 = inlined_call_operand.vmem [shape: f32[1,128], index: 10, kind: input, shape index: {}]   ;;  %s4168_s7 = inlined_call_operand.vmem [shape: f32[1,128], index: 7, kind: input, shape index: {}]   ;;  %s4169_s12 = inlined_call_operand.vmem [shape: f32[1,128], index: 12, kind: input, shape index: {}]   ;;  %s4170_s13 = inlined_call_operand.vmem [shape: f32[128,128], index: 13, kind: output, shape index: {}]  }
   0x1   :  { %3026 = vset.pattern.permute.xlu1 %v3091_v0  ;;  %3025 = vset.pattern.permute.xlu0 %v3091_v0  ;;  %v48_v1 = vld [vmem:[%s4157_s0 + $0x10] sm:$0xff]  ;;  %v46_v2 = vld [vmem:[%s4157_s0] sm:$0xff]  ;;  %v49_v3 = vld [vmem:[%s4157_s0 + $0x18] sm:$0xff] }
   0x2   :  { %69 = vperm.xlu1 %3026, %v48_v1   ;;  %63 = vperm.xlu0 %3025, %v46_v2   ;;  %v47_v4 = vld [vmem:[%s4157_s0 + $0x8] sm:$0xff]  ;;  %v50_v6 = vld [vmem:[%s4157_s0 + $0x20] sm:$0xff]  ;;  %v53_v7 = vld [vmem:[%s4157_s0 + $0x38] sm:$0xff]  ;;  %v3320_v53 = vand.u32 127, %v44_v52 }
   0x3   :  { %v51_v5 = vld [vmem:[%s4157_s0 + $0x28] sm:$0xff]  ;;  %v52_v8 = vld [vmem:[%s4157_s0 + $0x30] sm:$0xff]  ;;  %v54_v10 = vld [vmem:[%s4157_s0 + $0x40] sm:$0xff] }
   0x4   :  { %v55_v9 = vld [vmem:[%s4157_s0 + $0x48] sm:$0xff]  ;;  %v158_v12 = vld [vmem:[%s4158_s3] sm:$0xff]  ;;  %v57_v13 = vld [vmem:[%s4157_s0 + $0x58] sm:$0xff] }
   0x5   :  { %v159_v11 = vld [vmem:[%s4158_s3 + $0x8] sm:$0xff]  ;;  %v56_v14 = vld [vmem:[%s4157_s0 + $0x50] sm:$0xff]  ;;  %v3209_v15 = vld [vmem:[%s4159_s4 + $0x78] sm:$0xff] }
   0x6   :  { %72 = vperm.xlu1 %3026, %v49_v3   ;;  %66 = vperm.xlu0 %3025, %v47_v4   ;;  %v59_v16 = vld [vmem:[%s4157_s0 + $0x68] sm:$0xff]  ;;  %v58_v17 = vld [vmem:[%s4157_s0 + $0x60] sm:$0xff]  ;;  %v61_v18 = vld [vmem:[%s4157_s0 + $0x78] sm:$0xff] }
   0x7   :  { %2542 = vmatprep.subr.mxu0 %v159_v11  ;;  %2570 = vmatprep.subr.mxu1 %v159_v11  ;;  %v60_v19 = vld [vmem:[%s4157_s0 + $0x70] sm:$0xff]  ;;  %v660_v20 = vld [vmem:[%s4160_s2 + $0x8] sm:$0xff]  ;;  %v659_v21 = vld [vmem:[%s4160_s2] sm:$0xff] }
   0x8   :  { %2543 = vmatpush3.msra.mxu0 %v159_v11  ;;  %2571 = vmatpush3.msra.mxu1 %v159_v11  ;;  %v662_v22 = vld [vmem:[%s4160_s2 + $0x18] sm:$0xff]  ;;  %v661_v23 = vld [vmem:[%s4160_s2 + $0x10] sm:$0xff]  ;;  %v664_v24 = vld [vmem:[%s4160_s2 + $0x28] sm:$0xff] }
   0x9   :  { %2544 = vmatprep.subr.mxu0 %v158_v12  ;;  %2572 = vmatprep.subr.mxu1 %v158_v12  ;;  %v663_v25 = vld [vmem:[%s4160_s2 + $0x20] sm:$0xff]  ;;  %v666_v26 = vld [vmem:[%s4160_s2 + $0x38] sm:$0xff]  ;;  %v665_v27 = vld [vmem:[%s4160_s2 + $0x30] sm:$0xff] }
   0xa   :  { %78 = vperm.xlu1 %3026, %v51_v5   ;;  %75 = vperm.xlu0 %3025, %v50_v6   ;;  %v668_v28 = vld [vmem:[%s4160_s2 + $0x48] sm:$0xff]  ;;  %v667_v29 = vld [vmem:[%s4160_s2 + $0x40] sm:$0xff]  ;;  %v670_v30 = vld [vmem:[%s4160_s2 + $0x58] sm:$0xff] }
   0xb   :  { %2545 = vmatpush3.msra.mxu0 %v158_v12  ;;  %2573 = vmatpush3.msra.mxu1 %v158_v12  ;;  %v669_v31 = vld [vmem:[%s4160_s2 + $0x50] sm:$0xff]  ;;  %v672_v32 = vld [vmem:[%s4160_s2 + $0x68] sm:$0xff]  ;;  %v671_v33 = vld [vmem:[%s4160_s2 + $0x60] sm:$0xff] }
   0xc   :  { %2598 = vmatprep.subr.mxu0 %v3209_v15  ;;  %v674_v34 = vld [vmem:[%s4160_s2 + $0x78] sm:$0xff]  ;;  %v673_v35 = vld [vmem:[%s4160_s2 + $0x70] sm:$0xff]  ;;  %v355_v36 = vld [vmem:[%s4161_s1 + $0x8] sm:$0xff] }
   0xd   :  { %v354_v37 = vld [vmem:[%s4161_s1] sm:$0xff]  ;;  %v357_v38 = vld [vmem:[%s4161_s1 + $0x18] sm:$0xff]  ;;  %v356_v39 = vld [vmem:[%s4161_s1 + $0x10] sm:$0xff] }
   0xe   :  { %84 = vperm.xlu1 %3026, %v53_v7   ;;  %81 = vperm.xlu0 %3025, %v52_v8   ;;  %v359_v40 = vld [vmem:[%s4161_s1 + $0x28] sm:$0xff]  ;;  %v358_v41 = vld [vmem:[%s4161_s1 + $0x20] sm:$0xff]  ;;  %v361_v42 = vld [vmem:[%s4161_s1 + $0x38] sm:$0xff] }
   0xf   :  { %v360_v43 = vld [vmem:[%s4161_s1 + $0x30] sm:$0xff]  ;;  %v363_v44 = vld [vmem:[%s4161_s1 + $0x48] sm:$0xff]  ;;  %v362_v45 = vld [vmem:[%s4161_s1 + $0x40] sm:$0xff] }
  0x10   :  { %v365_v46 = vld [vmem:[%s4161_s1 + $0x58] sm:$0xff]  ;;  %v364_v47 = vld [vmem:[%s4161_s1 + $0x50] sm:$0xff]  ;;  %v367_v48 = vld [vmem:[%s4161_s1 + $0x68] sm:$0xff] }
  0x11   :  { %v366_v49 = vld [vmem:[%s4161_s1 + $0x60] sm:$0xff]  ;;  %v369_v50 = vld [vmem:[%s4161_s1 + $0x78] sm:$0xff]  ;;  %v368_v51 = vld [vmem:[%s4161_s1 + $0x70] sm:$0xff] }
  0x12   :  { %90 = vperm.xlu1 %3026, %v55_v9   ;;  %87 = vperm.xlu0 %3025, %v54_v10   ;;  %v785_v62 = vld [vmem:[%s4159_s4 + $0x70] sm:$0xff]  ;;  %v784_v1 = vld [vmem:[%s4159_s4 + $0x68] sm:$0xff]  ;;  %v783_v4 = vld [vmem:[%s4159_s4 + $0x60] sm:$0xff] }
  0x13   :  { %v782_v7 = vld [vmem:[%s4159_s4 + $0x58] sm:$0xff]  ;;  %v781_v10 = vld [vmem:[%s4159_s4 + $0x50] sm:$0xff] }
  0x14   :  { %v942_v52 = vld [vmem:[%s4162_s5 + $0x50] sm:$0xff] }
  0x16   :  { %96 = vperm.xlu1 %3026, %v57_v13   ;;  %93 = vperm.xlu0 %3025, %v56_v14   ;;  %v780_v13 = vld [vmem:[%s4159_s4 + $0x48] sm:$0xff] }
  0x1a   :  { %102 = vperm.xlu1 %3026, %v59_v16   ;;  %99 = vperm.xlu0 %3025, %v58_v17   ;;  %v779_v16 = vld [vmem:[%s4159_s4 + $0x40] sm:$0xff] }
  0x1e   :  { %108 = vperm.xlu1 %3026, %v61_v18   ;;  %105 = vperm.xlu0 %3025, %v60_v19   ;;  %v778_v19 = vld [vmem:[%s4159_s4 + $0x38] sm:$0xff] }
  0x22   :  { %679 = vperm.xlu1 %3026, %v660_v20   ;;  %676 = vperm.xlu0 %3025, %v659_v21  }
  0x26   :  { %685 = vperm.xlu1 %3026, %v662_v22   ;;  %682 = vperm.xlu0 %3025, %v661_v23   ;;  %v777_v22 = vld [vmem:[%s4159_s4 + $0x30] sm:$0xff] }
  0x2a   :  { %691 = vperm.xlu1 %3026, %v664_v24   ;;  %688 = vperm.xlu0 %3025, %v663_v25   ;;  %v776_v25 = vld [vmem:[%s4159_s4 + $0x28] sm:$0xff] }
  0x2e   :  { %697 = vperm.xlu1 %3026, %v666_v26   ;;  %694 = vperm.xlu0 %3025, %v665_v27  }
  0x32   :  { %703 = vperm.xlu1 %3026, %v668_v28   ;;  %700 = vperm.xlu0 %3025, %v667_v29   ;;  %v775_v28 = vld [vmem:[%s4159_s4 + $0x20] sm:$0xff] }
  0x36   :  { %709 = vperm.xlu1 %3026, %v670_v30   ;;  %706 = vperm.xlu0 %3025, %v669_v31   ;;  %v774_v31 = vld [vmem:[%s4159_s4 + $0x18] sm:$0xff] }
  0x3a   :  { %715 = vperm.xlu1 %3026, %v672_v32   ;;  %712 = vperm.xlu0 %3025, %v671_v33  }
  0x3e   :  { %721 = vperm.xlu1 %3026, %v674_v34   ;;  %718 = vperm.xlu0 %3025, %v673_v35   ;;  %v773_v34 = vld [vmem:[%s4159_s4 + $0x10] sm:$0xff] }
  0x42   :  { %374 = vperm.xlu1 %3026, %v355_v36   ;;  %371 = vperm.xlu0 %3025, %v354_v37   ;;  %v772_v37 = vld [vmem:[%s4159_s4 + $0x8] sm:$0xff] }
  0x46   :  { %380 = vperm.xlu1 %3026, %v357_v38   ;;  %377 = vperm.xlu0 %3025, %v356_v39   ;;  %v771_v39 = vld [vmem:[%s4159_s4] sm:$0xff] }
  0x4a   :  { %386 = vperm.xlu1 %3026, %v359_v40   ;;  %383 = vperm.xlu0 %3025, %v358_v41   ;;  %v3093_v41 = vmov 1.0  }
  0x4e   :  { %392 = vperm.xlu1 %3026, %v361_v42   ;;  %389 = vperm.xlu0 %3025, %v360_v43   ;;  %v947_v43 = vld [vmem:[%s4162_s5 + $0x78] sm:$0xff] }
  0x52   :  { %398 = vperm.xlu1 %3026, %v363_v44   ;;  %395 = vperm.xlu0 %3025, %v362_v45   ;;  %v946_v44 = vld [vmem:[%s4162_s5 + $0x70] sm:$0xff] }
  0x56   :  { %404 = vperm.xlu1 %3026, %v365_v46   ;;  %401 = vperm.xlu0 %3025, %v364_v47   ;;  %v945_v47 = vld [vmem:[%s4162_s5 + $0x68] sm:$0xff] }
  0x5a   :  { %410 = vperm.xlu1 %3026, %v367_v48   ;;  %407 = vperm.xlu0 %3025, %v366_v49   ;;  %v944_v48 = vld [vmem:[%s4162_s5 + $0x60] sm:$0xff] }
  0x5e   :  { %416 = vperm.xlu1 %3026, %v369_v50   ;;  %413 = vperm.xlu0 %3025, %v368_v51   ;;  %v943_v51 = vld [vmem:[%s4162_s5 + $0x58] sm:$0xff] }
  0x7d   :  { %v70_v54 = vpop.permute.xlu1 %69  ;;  %v64_v55 = vpop.permute.xlu0 %63 }
  0x7e   :  { %vm110_vm1 = vcmp.eq.s32.totalorder %v3320_v53, %v64_v55  ;;  %vm112_vm2 = vcmp.eq.s32.totalorder %v3320_v53, %v70_v54 }
  0x7f   :  { %v2167_v57 = vsel %vm110_vm1, 1.0, %v3092_v56  ;;  %v2169_v60 = vsel %vm112_vm2, 1.0, %v3092_v56 }
  0x80   :  { %2546 = vmatprep.mubr.msk.f32.mxu0 %vm160_vm0, %v2167_v57  ;;  %v941_v57 = vld [vmem:[%s4162_s5 + $0x48] sm:$0xff] }
  0x81   :  { %v73_v58 = vpop.permute.xlu1 %72  ;;  %v67_v59 = vpop.permute.xlu0 %66 }
  0x82   :  { %vm111_vm3 = vcmp.eq.s32.totalorder %v3320_v53, %v67_v59  ;;  %vm113_vm4 = vcmp.eq.s32.totalorder %v3320_v53, %v73_v58  ;;  %v940_v58 = vld [vmem:[%s4162_s5 + $0x40] sm:$0xff] }
  0x83   :  { %v2168_v61 = vsel %vm111_vm3, 1.0, %v3092_v56  ;;  %v2170_v2 = vsel %vm113_vm4, 1.0, %v3092_v56 }
  0x84   :  { %2547 = vmatmul.mubr.msk.f32.vlgmr.msra.gmra.mxu0 %vm160_vm0, %v2168_v61  ;;  %v939_v61 = vld [vmem:[%s4162_s5 + $0x38] sm:$0xff] }
  0x85   :  { %2599 = vmatpush3.msra.mxu0 %v3209_v15  ;;  %v79_v63 = vpop.permute.xlu1 %78  ;;  %2549 = vmatprep.mubr.msk.f32.mxu0 %vm160_vm0, %v2169_v60  ;;  %v76_v0 = vpop.permute.xlu0 %75 }
  0x86   :  { %2600 = vmatprep.subr.mxu0 %v785_v62  ;;  %vm114_vm5 = vcmp.eq.s32.totalorder %v3320_v53, %v76_v0  ;;  %vm115_vm6 = vcmp.eq.s32.totalorder %v3320_v53, %v79_v63 }
  0x87   :  { %v2171_v3 = vsel %vm114_vm5, 1.0, %v3092_v56  ;;  %2601 = vmatpush3.msra.mxu0 %v785_v62  ;;  %v2172_v8 = vsel %vm115_vm6, 1.0, %v3092_v56  ;;  %v938_v62 = vld [vmem:[%s4162_s5 + $0x30] sm:$0xff] }
  0x88   :  { %2602 = vmatprep.subr.mxu0 %v784_v1  ;;  %2550 = vmatmul.mubr.msk.f32.gmra.mxu0 %vm160_vm0, %v2170_v2  ;;  %v936_v2 = vld [vmem:[%s4162_s5 + $0x20] sm:$0xff] }
  0x89   :  { %2603 = vmatpush3.msra.mxu0 %v784_v1  ;;  %v85_v5 = vpop.permute.xlu1 %84  ;;  %2552 = vmatprep.mubr.msk.f32.mxu0 %vm160_vm0, %v2171_v3  ;;  %v82_v6 = vpop.permute.xlu0 %81  ;;  %v937_v1 = vld [vmem:[%s4162_s5 + $0x28] sm:$0xff] }
  0x8a   :  { %2604 = vmatprep.subr.mxu0 %v783_v4  ;;  %vm116_vm7 = vcmp.eq.s32.totalorder %v3320_v53, %v82_v6  ;;  %vm117_vm8 = vcmp.eq.s32.totalorder %v3320_v53, %v85_v5  ;;  %v935_v5 = vld [vmem:[%s4162_s5 + $0x18] sm:$0xff]  ;;  %v934_v6 = vld [vmem:[%s4162_s5 + $0x10] sm:$0xff] }
  0x8b   :  { %v2173_v9 = vsel %vm116_vm7, 1.0, %v3092_v56  ;;  %2605 = vmatpush3.msra.mxu0 %v783_v4  ;;  %v2174_v14 = vsel %vm117_vm8, 1.0, %v3092_v56 }
  0x8c   :  { %2606 = vmatprep.subr.mxu0 %v782_v7  ;;  %2553 = vmatmul.mubr.msk.f32.gmra.mxu0 %vm160_vm0, %v2172_v8 }
  0x8d   :  { %2607 = vmatpush3.msra.mxu0 %v782_v7  ;;  %v91_v11 = vpop.permute.xlu1 %90  ;;  %2555 = vmatprep.mubr.msk.f32.mxu0 %vm160_vm0, %v2173_v9  ;;  %v88_v12 = vpop.permute.xlu0 %87 }
  0x8e   :  { %2608 = vmatprep.subr.mxu0 %v781_v10  ;;  %vm118_vm9 = vcmp.eq.s32.totalorder %v3320_v53, %v88_v12  ;;  %vm119_vm10 = vcmp.eq.s32.totalorder %v3320_v53, %v91_v11 }
  0x8f   :  { %v2175_v15 = vsel %vm118_vm9, 1.0, %v3092_v56  ;;  %2609 = vmatpush3.msra.mxu0 %v781_v10  ;;  %v2176_v20 = vsel %vm119_vm10, 1.0, %v3092_v56 }
  0x90   :  { %2610 = vmatprep.subr.mxu0 %v780_v13  ;;  %2556 = vmatmul.mubr.msk.f32.gmra.mxu0 %vm160_vm0, %v2174_v14 }
  0x91   :  { %2611 = vmatpush3.msra.mxu0 %v780_v13  ;;  %v97_v17 = vpop.permute.xlu1 %96  ;;  %2558 = vmatprep.mubr.msk.f32.mxu0 %vm160_vm0, %v2175_v15  ;;  %v94_v18 = vpop.permute.xlu0 %93  ;;  %v933_v15 = vld [vmem:[%s4162_s5 + $0x8] sm:$0xff] }
  0x92   :  { %2612 = vmatprep.subr.mxu0 %v779_v16  ;;  %vm120_vm11 = vcmp.eq.s32.totalorder %v3320_v53, %v94_v18  ;;  %vm121_vm12 = vcmp.eq.s32.totalorder %v3320_v53, %v97_v17  ;;  %v932_v18 = vld [vmem:[%s4162_s5] sm:$0xff] }
  0x93   :  { %v2177_v21 = vsel %vm120_vm11, 1.0, %v3092_v56  ;;  %2613 = vmatpush3.msra.mxu0 %v779_v16  ;;  %v2178_v26 = vsel %vm121_vm12, 1.0, %v3092_v56 }
  0x94   :  { %2614 = vmatprep.subr.mxu0 %v778_v19  ;;  %2559 = vmatmul.mubr.msk.f32.gmra.mxu0 %vm160_vm0, %v2176_v20 }
  0x95   :  { %2615 = vmatpush3.msra.mxu0 %v778_v19  ;;  %v103_v23 = vpop.permute.xlu1 %102  ;;  %2561 = vmatprep.mubr.msk.f32.mxu0 %vm160_vm0, %v2177_v21  ;;  %v100_v24 = vpop.permute.xlu0 %99  ;;  %v963_v21 = vld [vmem:[%s4163_s6 + $0x78] sm:$0xff] }
  0x96   :  { %2616 = vmatprep.subr.mxu0 %v777_v22  ;;  %vm122_vm13 = vcmp.eq.s32.totalorder %v3320_v53, %v100_v24  ;;  %vm123_vm14 = vcmp.eq.s32.totalorder %v3320_v53, %v103_v23  ;;  %2654 = vmatprep.subr.mxu1 %v963_v21 }
  0x97   :  { %v2179_v27 = vsel %vm122_vm13, 1.0, %v3092_v56  ;;  %2617 = vmatpush3.msra.mxu0 %v777_v22  ;;  %v2180_v32 = vsel %vm123_vm14, 1.0, %v3092_v56  ;;  %v962_v22 = vld [vmem:[%s4163_s6 + $0x70] sm:$0xff] }
  0x98   :  { %2618 = vmatprep.subr.mxu0 %v776_v25  ;;  %2562 = vmatmul.mubr.msk.f32.gmra.mxu0 %vm160_vm0, %v2178_v26 }
  0x99   :  { %2619 = vmatpush3.msra.mxu0 %v776_v25  ;;  %v109_v29 = vpop.permute.xlu1 %108  ;;  %2564 = vmatprep.mubr.msk.f32.mxu0 %vm160_vm0, %v2179_v27  ;;  %v106_v30 = vpop.permute.xlu0 %105  ;;  %v961_v25 = vld [vmem:[%s4163_s6 + $0x68] sm:$0xff] }
  0x9a   :  { %2620 = vmatprep.subr.mxu0 %v775_v28  ;;  %vm124_vm15 = vcmp.eq.s32.totalorder %v3320_v53, %v106_v30  ;;  %vm125_vm1 = vcmp.eq.s32.totalorder %v3320_v53, %v109_v29 }
  0x9b   :  { %v2181_v33 = vsel %vm124_vm15, 1.0, %v3092_v56  ;;  %2621 = vmatpush3.msra.mxu0 %v775_v28  ;;  %v2182_v38 = vsel %vm125_vm1, 1.0, %v3092_v56  ;;  %v960_v28 = vld [vmem:[%s4163_s6 + $0x60] sm:$0xff] }
  0x9c   :  { %2622 = vmatprep.subr.mxu0 %v774_v31  ;;  %2565 = vmatmul.mubr.msk.f32.gmra.mxu0 %vm160_vm0, %v2180_v32 }
  0x9d   :  { %2623 = vmatpush3.msra.mxu0 %v774_v31  ;;  %v680_v35 = vpop.permute.xlu1 %679  ;;  %2567 = vmatprep.mubr.msk.f32.mxu0 %vm160_vm0, %v2181_v33  ;;  %v677_v36 = vpop.permute.xlu0 %676  ;;  %v959_v31 = vld [vmem:[%s4163_s6 + $0x58] sm:$0xff] }
  0x9e   :  { %2624 = vmatprep.subr.mxu0 %v773_v34  ;;  %vm723_vm2 = vcmp.eq.s32.totalorder %v3320_v53, %v677_v36  ;;  %vm724_vm3 = vcmp.eq.s32.totalorder %v3320_v53, %v680_v35 }
  0x9f   :  { %2625 = vmatpush3.msra.mxu0 %v773_v34  ;;  %v958_v34 = vld [vmem:[%s4163_s6 + $0x50] sm:$0xff] }
  0xa0   :  { %2626 = vmatprep.subr.mxu0 %v772_v37  ;;  %2568 = vmatmul.mubr.msk.f32.gmra.mxu0 %vm160_vm0, %v2182_v38 }
  0xa1   :  { %2627 = vmatpush3.msra.mxu0 %v772_v37  ;;  %v686_v40 = vpop.permute.xlu1 %685  ;;  %2630 = vmatprep.mubr.msk.f32.mxu0 %vm723_vm2, %v3093_v41  ;;  %v683_v42 = vpop.permute.xlu0 %682  ;;  %v957_v37 = vld [vmem:[%s4163_s6 + $0x48] sm:$0xff] }
  0xa2   :  { %2628 = vmatprep.subr.mxu0 %v771_v39  ;;  %vm725_vm4 = vcmp.eq.s32.totalorder %v3320_v53, %v683_v42  ;;  %vm726_vm5 = vcmp.eq.s32.totalorder %v3320_v53, %v686_v40  ;;  %v956_v40 = vld [vmem:[%s4163_s6 + $0x40] sm:$0xff] }
  0xa3   :  { %2629 = vmatpush3.msra.mxu0 %v771_v39 }
  0xa4   :  { %2631 = vmatmul.mubr.msk.f32.vlgmr.msra.gmra.mxu0 %vm724_vm3, %v3093_v41  ;;  %2710 = vmatprep.subr.mxu0 %v947_v43 }
  0xa5   :  { %v692_v45 = vpop.permute.xlu1 %691  ;;  %2633 = vmatprep.mubr.msk.f32.mxu0 %vm725_vm4, %v3093_v41  ;;  %v689_v46 = vpop.permute.xlu0 %688  ;;  %2711 = vmatpush3.msra.mxu0 %v947_v43  ;;  %v955_v43 = vld [vmem:[%s4163_s6 + $0x38] sm:$0xff] }
  0xa6   :  { %2712 = vmatprep.subr.mxu0 %v946_v44  ;;  %vm727_vm6 = vcmp.eq.s32.totalorder %v3320_v53, %v689_v46  ;;  %vm728_vm7 = vcmp.eq.s32.totalorder %v3320_v53, %v692_v45  ;;  %v954_v46 = vld [vmem:[%s4163_s6 + $0x30] sm:$0xff] }
  0xa7   :  { %2713 = vmatpush3.msra.mxu0 %v946_v44 }
  0xa8   :  { %2634 = vmatmul.mubr.msk.f32.gmra.mxu0 %vm726_vm5, %v3093_v41  ;;  %2714 = vmatprep.subr.mxu0 %v945_v47 }
  0xa9   :  { %v698_v49 = vpop.permute.xlu1 %697  ;;  %2636 = vmatprep.mubr.msk.f32.mxu0 %vm727_vm6, %v3093_v41  ;;  %v695_v50 = vpop.permute.xlu0 %694  ;;  %2715 = vmatpush3.msra.mxu0 %v945_v47 }
  0xaa   :  { %2716 = vmatprep.subr.mxu0 %v944_v48  ;;  %vm729_vm8 = vcmp.eq.s32.totalorder %v3320_v53, %v695_v50  ;;  %vm730_vm9 = vcmp.eq.s32.totalorder %v3320_v53, %v698_v49  ;;  %v953_v49 = vld [vmem:[%s4163_s6 + $0x28] sm:$0xff] }
  0xab   :  { %2717 = vmatpush3.msra.mxu0 %v944_v48 }
  0xac   :  { %2637 = vmatmul.mubr.msk.f32.gmra.mxu0 %vm728_vm7, %v3093_v41  ;;  %2718 = vmatprep.subr.mxu0 %v943_v51 }
  0xad   :  { %v704_v54 = vpop.permute.xlu1 %703  ;;  %2639 = vmatprep.mubr.msk.f32.mxu0 %vm729_vm8, %v3093_v41  ;;  %v701_v55 = vpop.permute.xlu0 %700  ;;  %2719 = vmatpush3.msra.mxu0 %v943_v51 }
  0xae   :  { %2720 = vmatprep.subr.mxu0 %v942_v52  ;;  %vm731_vm10 = vcmp.eq.s32.totalorder %v3320_v53, %v701_v55  ;;  %vm732_vm11 = vcmp.eq.s32.totalorder %v3320_v53, %v704_v54  ;;  %v951_v54 = vld [vmem:[%s4163_s6 + $0x18] sm:$0xff]  ;;  %v949_v55 = vld [vmem:[%s4163_s6 + $0x8] sm:$0xff] }
  0xaf   :  { %2721 = vmatpush3.msra.mxu0 %v942_v52  ;;  %v952_v52 = vld [vmem:[%s4163_s6 + $0x20] sm:$0xff] }
  0xb0   :  { %2640 = vmatmul.mubr.msk.f32.gmra.mxu0 %vm730_vm9, %v3093_v41  ;;  %2722 = vmatprep.subr.mxu0 %v941_v57 }
  0xb1   :  { %v710_v59 = vpop.permute.xlu1 %709  ;;  %2642 = vmatprep.mubr.msk.f32.mxu0 %vm731_vm10, %v3093_v41  ;;  %v707_v60 = vpop.permute.xlu0 %706  ;;  %2723 = vmatpush3.msra.mxu0 %v941_v57  ;;  %v948_v57 = vld [vmem:[%s4163_s6] sm:$0xff] }
  0xb2   :  { %2724 = vmatprep.subr.mxu0 %v940_v58  ;;  %vm733_vm12 = vcmp.eq.s32.totalorder %v3320_v53, %v707_v60  ;;  %vm734_vm13 = vcmp.eq.s32.totalorder %v3320_v53, %v710_v59  ;;  %v3598_v59 = vld [vmem:[%s4165_s9 + $0x78] sm:$0xff] }
  0xb3   :  { %2725 = vmatpush3.msra.mxu0 %v940_v58  ;;  %v1308_v58 = vld [vmem:[%s4164_s8 + $0x78] sm:$0xff] }
  0xb4   :  { %2643 = vmatmul.mubr.msk.f32.gmra.mxu0 %vm732_vm11, %v3093_v41  ;;  %2726 = vmatprep.subr.mxu0 %v939_v61 }
  0xb5   :  { %v716_v63 = vpop.permute.xlu1 %715  ;;  %2645 = vmatprep.mubr.msk.f32.mxu0 %vm733_vm12, %v3093_v41  ;;  %v713_v0 = vpop.permute.xlu0 %712  ;;  %2727 = vmatpush3.msra.mxu0 %v939_v61 }
  0xb6   :  { %2728 = vmatprep.subr.mxu0 %v938_v62  ;;  %vm735_vm14 = vcmp.eq.s32.totalorder %v3320_v53, %v713_v0  ;;  %vm736_vm15 = vcmp.eq.s32.totalorder %v3320_v53, %v716_v63  ;;  %v1306_v0 = vld [vmem:[%s4164_s8 + $0x68] sm:$0xff] }
  0xb7   :  { %2729 = vmatpush3.msra.mxu0 %v938_v62  ;;  %v1307_v62 = vld [vmem:[%s4164_s8 + $0x70] sm:$0xff] }
  0xb8   :  { %2646 = vmatmul.mubr.msk.f32.gmra.mxu0 %vm734_vm13, %v3093_v41  ;;  %2730 = vmatprep.subr.mxu0 %v937_v1 }
  0xb9   :  { %v722_v3 = vpop.permute.xlu1 %721  ;;  %2648 = vmatprep.mubr.msk.f32.mxu0 %vm735_vm14, %v3093_v41  ;;  %v719_v4 = vpop.permute.xlu0 %718  ;;  %2731 = vmatpush3.msra.mxu0 %v937_v1 }
  0xba   :  { %2732 = vmatprep.subr.mxu0 %v936_v2  ;;  %vm737_vm1 = vcmp.eq.s32.totalorder %v3320_v53, %v719_v4  ;;  %vm738_vm4 = vcmp.eq.s32.totalorder %v3320_v53, %v722_v3  ;;  %v1304_v4 = vld [vmem:[%s4164_s8 + $0x58] sm:$0xff] }
  0xbb   :  { %2733 = vmatpush3.msra.mxu0 %v936_v2  ;;  %v1305_v2 = vld [vmem:[%s4164_s8 + $0x60] sm:$0xff] }
  0xbc   :  { %2649 = vmatmul.mubr.msk.f32.gmra.mxu0 %vm736_vm15, %v3093_v41  ;;  %2734 = vmatprep.subr.mxu0 %v935_v5 }
  0xbd   :  { %v375_v7 = vpop.permute.xlu1 %374  ;;  %2651 = vmatprep.mubr.msk.f32.mxu0 %vm737_vm1, %v3093_v41  ;;  %v372_v8 = vpop.permute.xlu0 %371  ;;  %2735 = vmatpush3.msra.mxu0 %v935_v5 }
  0xbe   :  { %vm419_vm2 = vcmp.eq.s32.totalorder %v3320_v53, %v375_v7  ;;  %vm418_vm3 = vcmp.eq.s32.totalorder %v3320_v53, %v372_v8  ;;  %2736 = vmatprep.subr.mxu0 %v934_v6  ;;  %v1302_v8 = vld [vmem:[%s4164_s8 + $0x48] sm:$0xff] }
  0xbf   :  { %v2200_v9 = vsel %vm419_vm2, 1.0, %v3092_v56  ;;  %v2199_v10 = vsel %vm418_vm3, 1.0, %v3092_v56  ;;  %2737 = vmatpush3.msra.mxu0 %v934_v6  ;;  %v1303_v6 = vld [vmem:[%s4164_s8 + $0x50] sm:$0xff] }
  0xc0   :  { %2574 = vmatprep.mubr.msk.f32.mxu1 %vm160_vm0, %v2199_v10  ;;  %2652 = vmatmul.mubr.msk.f32.gmra.mxu0 %vm738_vm4, %v3093_v41  ;;  %v1301_v10 = vld [vmem:[%s4164_s8 + $0x40] sm:$0xff]  ;;  %vm2114_vm4 = vcmp.eq.s32.totalorder %v3320_v53, 1 }
  0xc1   :  { %v381_v11 = vpop.permute.xlu1 %380  ;;  %2575 = vmatmul.mubr.msk.f32.vlgmr.msra.gmra.mxu1 %vm160_vm0, %v2200_v9  ;;  %v378_v12 = vpop.permute.xlu0 %377  ;;  %2738 = vmatprep.subr.mxu0 %v933_v15 }
  0xc2   :  { %vm421_vm5 = vcmp.eq.s32.totalorder %v3320_v53, %v381_v11  ;;  %vm420_vm6 = vcmp.eq.s32.totalorder %v3320_v53, %v378_v12  ;;  %2739 = vmatpush3.msra.mxu0 %v933_v15  ;;  %2655 = vmatpush3.msra.mxu1 %v963_v21  ;;  %v1300_v12 = vld [vmem:[%s4164_s8 + $0x38] sm:$0xff] }
  0xc3   :  { %v2202_v13 = vsel %vm421_vm5, 1.0, %v3092_v56  ;;  %v2201_v14 = vsel %vm420_vm6, 1.0, %v3092_v56  ;;  %2740 = vmatprep.subr.mxu0 %v932_v18  ;;  %2656 = vmatprep.subr.mxu1 %v962_v22 }
  0xc4   :  { %2577 = vmatprep.mubr.msk.f32.mxu1 %vm160_vm0, %v2201_v14  ;;  %2741 = vmatpush3.msra.mxu0 %v932_v18  ;;  %v1299_v14 = vld [vmem:[%s4164_s8 + $0x30] sm:$0xff]  ;;  %v1297_v18 = vld [vmem:[%s4164_s8 + $0x20] sm:$0xff] }
  0xc5   :  { %v387_v16 = vpop.permute.xlu1 %386  ;;  %2578 = vmatmul.mubr.msk.f32.gmra.mxu1 %vm160_vm0, %v2202_v13  ;;  %v384_v17 = vpop.permute.xlu0 %383  ;;  %2822 = vmatprep.subr.mxu0 %v1308_v58 }
  0xc6   :  { %vm423_vm7 = vcmp.eq.s32.totalorder %v3320_v53, %v387_v16  ;;  %vm422_vm8 = vcmp.eq.s32.totalorder %v3320_v53, %v384_v17  ;;  %2657 = vmatpush3.msra.mxu1 %v962_v22  ;;  %v1298_v16 = vld [vmem:[%s4164_s8 + $0x28] sm:$0xff]  ;;  %v1295_v22 = vld [vmem:[%s4164_s8 + $0x10] sm:$0xff] }
  0xc7   :  { %v2204_v19 = vsel %vm423_vm7, 1.0, %v3092_v56  ;;  %v2203_v20 = vsel %vm422_vm8, 1.0, %v3092_v56  ;;  %2658 = vmatprep.subr.mxu1 %v961_v25 }
  0xc8   :  { %2580 = vmatprep.mubr.msk.f32.mxu1 %vm160_vm0, %v2203_v20  ;;  %2659 = vmatpush3.msra.mxu1 %v961_v25  ;;  %v1296_v20 = vld [vmem:[%s4164_s8 + $0x18] sm:$0xff] }
  0xc9   :  { %v393_v23 = vpop.permute.xlu1 %392  ;;  %2581 = vmatmul.mubr.msk.f32.gmra.mxu1 %vm160_vm0, %v2204_v19  ;;  %v390_v24 = vpop.permute.xlu0 %389  ;;  %2660 = vmatprep.subr.mxu1 %v960_v28 }
  0xca   :  { %vm425_vm9 = vcmp.eq.s32.totalorder %v3320_v53, %v393_v23  ;;  %vm424_vm10 = vcmp.eq.s32.totalorder %v3320_v53, %v390_v24  ;;  %2661 = vmatpush3.msra.mxu1 %v960_v28  ;;  %v1294_v24 = vld [vmem:[%s4164_s8 + $0x8] sm:$0xff] }
  0xcb   :  { %v2206_v26 = vsel %vm425_vm9, 1.0, %v3092_v56  ;;  %v2205_v27 = vsel %vm424_vm10, 1.0, %v3092_v56  ;;  %2662 = vmatprep.subr.mxu1 %v959_v31 }
  0xcc   :  { %2583 = vmatprep.mubr.msk.f32.mxu1 %vm160_vm0, %v2205_v27  ;;  %2663 = vmatpush3.msra.mxu1 %v959_v31  ;;  %v1322_v31 = vld [vmem:[%s4165_s9 + $0x68] sm:$0xff] }
  0xcd   :  { %v399_v29 = vpop.permute.xlu1 %398  ;;  %2584 = vmatmul.mubr.msk.f32.gmra.mxu1 %vm160_vm0, %v2206_v26  ;;  %v396_v30 = vpop.permute.xlu0 %395  ;;  %2664 = vmatprep.subr.mxu1 %v958_v34  ;;  %v1293_v26 = vld [vmem:[%s4164_s8] sm:$0xff] }
  0xce   :  { %vm427_vm11 = vcmp.eq.s32.totalorder %v3320_v53, %v399_v29  ;;  %vm426_vm12 = vcmp.eq.s32.totalorder %v3320_v53, %v396_v30  ;;  %2665 = vmatpush3.msra.mxu1 %v958_v34  ;;  %v1323_v29 = vld [vmem:[%s4165_s9 + $0x70] sm:$0xff] }
  0xcf   :  { %v2208_v32 = vsel %vm427_vm11, 1.0, %v3092_v56  ;;  %v2207_v33 = vsel %vm426_vm12, 1.0, %v3092_v56  ;;  %2666 = vmatprep.subr.mxu1 %v957_v37 }
  0xd0   :  { %2586 = vmatprep.mubr.msk.f32.mxu1 %vm160_vm0, %v2207_v33  ;;  %2667 = vmatpush3.msra.mxu1 %v957_v37  ;;  %v1321_v33 = vld [vmem:[%s4165_s9 + $0x60] sm:$0xff]  ;;  %v1319_v37 = vld [vmem:[%s4165_s9 + $0x50] sm:$0xff] }
  0xd1   :  { %v405_v35 = vpop.permute.xlu1 %404  ;;  %2587 = vmatmul.mubr.msk.f32.gmra.mxu1 %vm160_vm0, %v2208_v32  ;;  %v402_v36 = vpop.permute.xlu0 %401  ;;  %2668 = vmatprep.subr.mxu1 %v956_v40 }
  0xd2   :  { %vm429_vm13 = vcmp.eq.s32.totalorder %v3320_v53, %v405_v35  ;;  %vm428_vm14 = vcmp.eq.s32.totalorder %v3320_v53, %v402_v36  ;;  %2669 = vmatpush3.msra.mxu1 %v956_v40  ;;  %v1320_v35 = vld [vmem:[%s4165_s9 + $0x58] sm:$0xff] }
  0xd3   :  { %v2210_v38 = vsel %vm429_vm13, 1.0, %v3092_v56  ;;  %v2209_v39 = vsel %vm428_vm14, 1.0, %v3092_v56  ;;  %2670 = vmatprep.subr.mxu1 %v955_v43 }
  0xd4   :  { %2589 = vmatprep.mubr.msk.f32.mxu1 %vm160_vm0, %v2209_v39  ;;  %2671 = vmatpush3.msra.mxu1 %v955_v43  ;;  %v1318_v39 = vld [vmem:[%s4165_s9 + $0x48] sm:$0xff]  ;;  %v1316_v43 = vld [vmem:[%s4165_s9 + $0x38] sm:$0xff] }
  0xd5   :  { %v411_v41 = vpop.permute.xlu1 %410  ;;  %2590 = vmatmul.mubr.msk.f32.gmra.mxu1 %vm160_vm0, %v2210_v38  ;;  %v408_v42 = vpop.permute.xlu0 %407  ;;  %2672 = vmatprep.subr.mxu1 %v954_v46 }
  0xd6   :  { %vm431_vm15 = vcmp.eq.s32.totalorder %v3320_v53, %v411_v41  ;;  %vm430_vm1 = vcmp.eq.s32.totalorder %v3320_v53, %v408_v42  ;;  %2673 = vmatpush3.msra.mxu1 %v954_v46  ;;  %v1317_v41 = vld [vmem:[%s4165_s9 + $0x40] sm:$0xff] }
  0xd7   :  { %v2212_v44 = vsel %vm431_vm15, 1.0, %v3092_v56  ;;  %v2211_v45 = vsel %vm430_vm1, 1.0, %v3092_v56  ;;  %2674 = vmatprep.subr.mxu1 %v953_v49 }
  0xd8   :  { %2592 = vmatprep.mubr.msk.f32.mxu1 %vm160_vm0, %v2211_v45  ;;  %2675 = vmatpush3.msra.mxu1 %v953_v49  ;;  %v1315_v45 = vld [vmem:[%s4165_s9 + $0x30] sm:$0xff]  ;;  %v1313_v49 = vld [vmem:[%s4165_s9 + $0x20] sm:$0xff] }
  0xd9   :  { %v417_v47 = vpop.permute.xlu1 %416  ;;  %2593 = vmatmul.mubr.msk.f32.gmra.mxu1 %vm160_vm0, %v2212_v44  ;;  %v414_v48 = vpop.permute.xlu0 %413  ;;  %2676 = vmatprep.subr.mxu1 %v952_v52 }
  0xda   :  { %vm433_vm2 = vcmp.eq.s32.totalorder %v3320_v53, %v417_v47  ;;  %vm432_vm3 = vcmp.eq.s32.totalorder %v3320_v53, %v414_v48  ;;  %2677 = vmatpush3.msra.mxu1 %v952_v52  ;;  %v1314_v47 = vld [vmem:[%s4165_s9 + $0x28] sm:$0xff] }
  0xdb   :  { %v2214_v50 = vsel %vm433_vm2, 1.0, %v3092_v56  ;;  %v2213_v51 = vsel %vm432_vm3, 1.0, %v3092_v56  ;;  %v950_v56 = vld [vmem:[%s4163_s6 + $0x10] sm:$0xff]  ;;  %2678 = vmatprep.subr.mxu1 %v951_v54 }
  0xdc   :  { %2595 = vmatprep.mubr.msk.f32.mxu1 %vm160_vm0, %v2213_v51  ;;  %2679 = vmatpush3.msra.mxu1 %v951_v54  ;;  %v1312_v51 = vld [vmem:[%s4165_s9 + $0x18] sm:$0xff]  ;;  %v1311_v54 = vld [vmem:[%s4165_s9 + $0x10] sm:$0xff] }
  0xdd   :  { %2596 = vmatmul.mubr.msk.f32.gmra.mxu1 %vm160_vm0, %v2214_v50  ;;  %2680 = vmatprep.subr.mxu1 %v950_v56  ;;  %vm1871_vm0 = vcmp.eq.s32.totalorder %v3320_v53, 0 }
  0xde   :  { %2681 = vmatpush3.msra.mxu1 %v950_v56 }
  0xdf   :  { %2682 = vmatprep.subr.mxu1 %v949_v55 }
  0xe0   :  { %2683 = vmatpush3.msra.mxu1 %v949_v55 }
  0xe1   :  { %2684 = vmatprep.subr.mxu1 %v948_v57 }
  0xe2   :  { %2685 = vmatpush3.msra.mxu1 %v948_v57  ;;  %v1310_v57 = vld [vmem:[%s4165_s9 + $0x8] sm:$0xff] }
  0xe3   :  { %2766 = vmatprep.subr.mxu1 %v3598_v59 }
 0x144   :  { %v2548_v60 = vpop.f32.mrf.mxu0 }
 0x146   :  { %v275_v61 = vpop.f32.mrf.mxu0 }
 0x147   :  { %2742 = vmatprep.mubr.f32.mxu0 %v275_v61 }
 0x148   :  { %v2551_v63 = vpop.f32.mrf.mxu0  ;;  %2743 = vmatmul.mubr.f32.vlgmr.msra.gmra.mxu0 %v2548_v60  ;;  %v1309_v60 = vld [vmem:[%s4165_s9] sm:$0xff] }
 0x149   :  { %2823 = vmatpush3.msra.mxu0 %v1308_v58 }
 0x14a   :  { %v285_v1 = vpop.f32.mrf.mxu0  ;;  %2824 = vmatprep.subr.mxu0 %v1307_v62 }
 0x14b   :  { %2745 = vmatprep.mubr.f32.mxu0 %v285_v1  ;;  %2825 = vmatpush3.msra.mxu0 %v1307_v62 }
 0x14c   :  { %v2554_v3 = vpop.f32.mrf.mxu0  ;;  %2746 = vmatmul.mubr.f32.gmra.mxu0 %v2551_v63  ;;  %2826 = vmatprep.subr.mxu0 %v1306_v0 }
 0x14d   :  { %2827 = vmatpush3.msra.mxu0 %v1306_v0 }
 0x14e   :  { %v295_v5 = vpop.f32.mrf.mxu0  ;;  %2828 = vmatprep.subr.mxu0 %v1305_v2 }
 0x14f   :  { %2748 = vmatprep.mubr.f32.mxu0 %v295_v5  ;;  %2829 = vmatpush3.msra.mxu0 %v1305_v2 }
 0x150   :  { %v2557_v7 = vpop.f32.mrf.mxu0  ;;  %2749 = vmatmul.mubr.f32.gmra.mxu0 %v2554_v3  ;;  %2830 = vmatprep.subr.mxu0 %v1304_v4 }
 0x151   :  { %2831 = vmatpush3.msra.mxu0 %v1304_v4 }
 0x152   :  { %v305_v9 = vpop.f32.mrf.mxu0  ;;  %2832 = vmatprep.subr.mxu0 %v1303_v6 }
 0x153   :  { %2751 = vmatprep.mubr.f32.mxu0 %v305_v9  ;;  %2833 = vmatpush3.msra.mxu0 %v1303_v6 }
 0x154   :  { %v2560_v11 = vpop.f32.mrf.mxu0  ;;  %2752 = vmatmul.mubr.f32.gmra.mxu0 %v2557_v7  ;;  %2834 = vmatprep.subr.mxu0 %v1302_v8 }
 0x155   :  { %2835 = vmatpush3.msra.mxu0 %v1302_v8 }
 0x156   :  { %v315_v13 = vpop.f32.mrf.mxu0  ;;  %2836 = vmatprep.subr.mxu0 %v1301_v10 }
 0x157   :  { %2754 = vmatprep.mubr.f32.mxu0 %v315_v13  ;;  %2837 = vmatpush3.msra.mxu0 %v1301_v10  ;;  %v3753_v13 = vld [vmem:[%s4166_s11 + $0xf0] sm:$0xff] }
 0x158   :  { %v2563_v15 = vpop.f32.mrf.mxu0  ;;  %2755 = vmatmul.mubr.f32.gmra.mxu0 %v2560_v11  ;;  %2838 = vmatprep.subr.mxu0 %v1300_v12  ;;  %v3743_v11 = vld [vmem:[%s4166_s11 + $0xf8] sm:$0xff] }
 0x159   :  { %2839 = vmatpush3.msra.mxu0 %v1300_v12  ;;  %v1677_v12 = vld [vmem:[%s4166_s11 + $0x78] sm:$0xff] }
 0x15a   :  { %v325_v17 = vpop.f32.mrf.mxu0  ;;  %2840 = vmatprep.subr.mxu0 %v1299_v14 }
 0x15b   :  { %2757 = vmatprep.mubr.f32.mxu0 %v325_v17  ;;  %2841 = vmatpush3.msra.mxu0 %v1299_v14  ;;  %v1676_v14 = vld [vmem:[%s4166_s11 + $0x70] sm:$0xff]  ;;  %v3773_v17 = vld [vmem:[%s4166_s11 + $0xe0] sm:$0xff] }
 0x15c   :  { %v2566_v19 = vpop.f32.mrf.mxu0  ;;  %2758 = vmatmul.mubr.f32.gmra.mxu0 %v2563_v15  ;;  %2842 = vmatprep.subr.mxu0 %v1298_v16  ;;  %v3763_v15 = vld [vmem:[%s4166_s11 + $0xe8] sm:$0xff] }
 0x15d   :  { %2843 = vmatpush3.msra.mxu0 %v1298_v16  ;;  %v1675_v16 = vld [vmem:[%s4166_s11 + $0x68] sm:$0xff] }
 0x15e   :  { %v335_v21 = vpop.f32.mrf.mxu0  ;;  %2844 = vmatprep.subr.mxu0 %v1297_v18 }
 0x15f   :  { %2760 = vmatprep.mubr.f32.mxu0 %v335_v21  ;;  %2845 = vmatpush3.msra.mxu0 %v1297_v18  ;;  %v1674_v18 = vld [vmem:[%s4166_s11 + $0x60] sm:$0xff]  ;;  %v3793_v21 = vld [vmem:[%s4166_s11 + $0xd0] sm:$0xff] }
 0x160   :  { %v2569_v23 = vpop.f32.mrf.mxu0  ;;  %2761 = vmatmul.mubr.f32.gmra.mxu0 %v2566_v19  ;;  %2846 = vmatprep.subr.mxu0 %v1296_v20  ;;  %v3783_v19 = vld [vmem:[%s4166_s11 + $0xd8] sm:$0xff] }
 0x161   :  { %2847 = vmatpush3.msra.mxu0 %v1296_v20  ;;  %v1673_v20 = vld [vmem:[%s4166_s11 + $0x58] sm:$0xff] }
 0x162   :  { %v345_v25 = vpop.f32.mrf.mxu0  ;;  %2848 = vmatprep.subr.mxu0 %v1295_v22 }
 0x163   :  { %2763 = vmatprep.mubr.f32.mxu0 %v345_v25  ;;  %2849 = vmatpush3.msra.mxu0 %v1295_v22  ;;  %v1672_v22 = vld [vmem:[%s4166_s11 + $0x50] sm:$0xff]  ;;  %v3813_v25 = vld [vmem:[%s4166_s11 + $0xc0] sm:$0xff] }
 0x164   :  { %v3646_v27 = vpop.f32.mrf.mxu0  ;;  %2764 = vmatmul.mubr.f32.gmra.mxu0 %v2569_v23  ;;  %2850 = vmatprep.subr.mxu0 %v1294_v24  ;;  %v3803_v23 = vld [vmem:[%s4166_s11 + $0xc8] sm:$0xff] }
 0x165   :  { %2851 = vmatpush3.msra.mxu0 %v1294_v24  ;;  %v1671_v24 = vld [vmem:[%s4166_s11 + $0x48] sm:$0xff] }
 0x166   :  { %v3648_v28 = vpop.f32.mrf.mxu0  ;;  %2852 = vmatprep.subr.mxu0 %v1293_v26 }
 0x167   :  { %2686 = vmatprep.mubr.f32.mxu1 %v3648_v28  ;;  %2853 = vmatpush3.msra.mxu0 %v1293_v26  ;;  %v1670_v26 = vld [vmem:[%s4166_s11 + $0x40] sm:$0xff] }
 0x168   :  { %v3654_v30 = vpop.f32.mrf.mxu0  ;;  %2687 = vmatmul.mubr.f32.vlgmr.msra.gmra.mxu1 %v3646_v27  ;;  %2934 = vmatprep.subr.mxu0 %v3743_v11 }
 0x169   :  { %2767 = vmatpush3.msra.mxu1 %v3598_v59 }
 0x16a   :  { %2768 = vmatprep.subr.mxu1 %v1323_v29  ;;  %v3661_v32 = vpop.f32.mrf.mxu0 }
 0x16b   :  { %2769 = vmatpush3.msra.mxu1 %v1323_v29  ;;  %2689 = vmatprep.mubr.f32.mxu1 %v3661_v32  ;;  %v3833_v29 = vld [vmem:[%s4166_s11 + $0xb0] sm:$0xff] }
 0x16c   :  { %2770 = vmatprep.subr.mxu1 %v1322_v31  ;;  %v3667_v34 = vpop.f32.mrf.mxu0  ;;  %2690 = vmatmul.mubr.f32.gmra.mxu1 %v3654_v30 }
 0x16d   :  { %2771 = vmatpush3.msra.mxu1 %v1322_v31  ;;  %v3843_v31 = vld [vmem:[%s4166_s11 + $0xa8] sm:$0xff] }
 0x16e   :  { %2772 = vmatprep.subr.mxu1 %v1321_v33  ;;  %v3673_v36 = vpop.f32.mrf.mxu0 }
 0x16f   :  { %2773 = vmatpush3.msra.mxu1 %v1321_v33  ;;  %2692 = vmatprep.mubr.f32.mxu1 %v3673_v36  ;;  %v3853_v33 = vld [vmem:[%s4166_s11 + $0xa0] sm:$0xff] }
 0x170   :  { %2774 = vmatprep.subr.mxu1 %v1320_v35  ;;  %v3679_v38 = vpop.f32.mrf.mxu0  ;;  %2693 = vmatmul.mubr.f32.gmra.mxu1 %v3667_v34 }
 0x171   :  { %2775 = vmatpush3.msra.mxu1 %v1320_v35  ;;  %v3863_v35 = vld [vmem:[%s4166_s11 + $0x98] sm:$0xff] }
 0x172   :  { %2776 = vmatprep.subr.mxu1 %v1319_v37  ;;  %v3685_v40 = vpop.f32.mrf.mxu0 }
 0x173   :  { %2777 = vmatpush3.msra.mxu1 %v1319_v37  ;;  %2695 = vmatprep.mubr.f32.mxu1 %v3685_v40  ;;  %v3873_v37 = vld [vmem:[%s4166_s11 + $0x90] sm:$0xff] }
 0x174   :  { %2778 = vmatprep.subr.mxu1 %v1318_v39  ;;  %v3691_v42 = vpop.f32.mrf.mxu0  ;;  %2696 = vmatmul.mubr.f32.gmra.mxu1 %v3679_v38 }
 0x175   :  { %2779 = vmatpush3.msra.mxu1 %v1318_v39  ;;  %v3883_v39 = vld [vmem:[%s4166_s11 + $0x88] sm:$0xff] }
 0x176   :  { %2780 = vmatprep.subr.mxu1 %v1317_v41  ;;  %v3697_v44 = vpop.f32.mrf.mxu0 }
 0x177   :  { %2781 = vmatpush3.msra.mxu1 %v1317_v41  ;;  %2698 = vmatprep.mubr.f32.mxu1 %v3697_v44  ;;  %v3893_v41 = vld [vmem:[%s4166_s11 + $0x80] sm:$0xff] }
 0x178   :  { %2782 = vmatprep.subr.mxu1 %v1316_v43  ;;  %v3703_v46 = vpop.f32.mrf.mxu0  ;;  %2699 = vmatmul.mubr.f32.gmra.mxu1 %v3691_v42 }
 0x179   :  { %2783 = vmatpush3.msra.mxu1 %v1316_v43 }
 0x17a   :  { %2784 = vmatprep.subr.mxu1 %v1315_v45  ;;  %v903_v48 = vpop.f32.mrf.mxu0 }
 0x17b   :  { %2785 = vmatpush3.msra.mxu1 %v1315_v45  ;;  %2701 = vmatprep.mubr.f32.mxu1 %v903_v48 }
 0x17c   :  { %2786 = vmatprep.subr.mxu1 %v1314_v47  ;;  %v3712_v50 = vpop.f32.mrf.mxu0  ;;  %2702 = vmatmul.mubr.f32.gmra.mxu1 %v3703_v46 }
 0x17d   :  { %2787 = vmatpush3.msra.mxu1 %v1314_v47 }
 0x17e   :  { %2788 = vmatprep.subr.mxu1 %v1313_v49  ;;  %v913_v52 = vpop.f32.mrf.mxu0 }
 0x17f   :  { %2789 = vmatpush3.msra.mxu1 %v1313_v49  ;;  %2704 = vmatprep.mubr.f32.mxu1 %v913_v52 }
 0x180   :  { %2790 = vmatprep.subr.mxu1 %v1312_v51  ;;  %v2653_v56 = vpop.f32.mrf.mxu0  ;;  %2705 = vmatmul.mubr.f32.gmra.mxu1 %v3712_v50 }
 0x181   :  { %2791 = vmatpush3.msra.mxu1 %v1312_v51  ;;  %v2576_v55 = vpop.f32.mrf.mxu1 }
 0x182   :  { %2792 = vmatprep.subr.mxu1 %v1311_v54  ;;  %v923_v58 = vpop.f32.mrf.mxu0 }
 0x183   :  { %2793 = vmatpush3.msra.mxu1 %v1311_v54  ;;  %v580_v59 = vpop.f32.mrf.mxu1  ;;  %2707 = vmatprep.mubr.f32.mxu1 %v923_v58 }
 0x184   :  { %2794 = vmatprep.subr.mxu1 %v1310_v57  ;;  %2708 = vmatmul.mubr.f32.gmra.mxu1 %v2653_v56 }
 0x185   :  { %2795 = vmatpush3.msra.mxu1 %v1310_v57  ;;  %2854 = vmatprep.mubr.f32.mxu0 %v580_v59  ;;  %v2579_v61 = vpop.f32.mrf.mxu1 }
 0x186   :  { %2796 = vmatprep.subr.mxu1 %v1309_v60  ;;  %2798 = vmatprep.mubr.f32.mxu1 %v3648_v28  ;;  %v1669_v28 = vld [vmem:[%s4166_s11 + $0x38] sm:$0xff] }
 0x187   :  { %2855 = vmatmul.mubr.f32.vlgmr.msra.gmra.mxu0 %v2576_v55  ;;  %2797 = vmatpush3.msra.mxu1 %v1309_v60  ;;  %v590_v62 = vpop.f32.mrf.mxu1 }
 0x188   :  { %2799 = vmatmul.mubr.f32.vlgmr.msra.gmra.mxu1 %v3646_v27  ;;  %2857 = vmatprep.mubr.f32.mxu0 %v590_v62  ;;  %v3823_v27 = vld [vmem:[%s4166_s11 + $0xb8] sm:$0xff] }
 0x189   :  { %v2582_v63 = vpop.f32.mrf.mxu1  ;;  %2801 = vmatprep.mubr.f32.mxu1 %v3661_v32  ;;  %2878 = vmatprep.subr.mxu1 %v1677_v12  ;;  %v1667_v32 = vld [vmem:[%s4166_s11 + $0x28] sm:$0xff] }
 0x18a   :  { %2935 = vmatpush3.msra.mxu0 %v3743_v11  ;;  %2879 = vmatpush3.msra.mxu1 %v1677_v12 }
 0x18b   :  { %2858 = vmatmul.mubr.f32.gmra.mxu0 %v2579_v61  ;;  %v600_v0 = vpop.f32.mrf.mxu1  ;;  %2936 = vmatprep.subr.mxu0 %v3753_v13 }
 0x18c   :  { %2802 = vmatmul.mubr.f32.gmra.mxu1 %v3654_v30  ;;  %2860 = vmatprep.mubr.f32.mxu0 %v600_v0  ;;  %v1668_v30 = vld [vmem:[%s4166_s11 + $0x30] sm:$0xff] }
 0x18d   :  { %v2585_v1 = vpop.f32.mrf.mxu1  ;;  %2804 = vmatprep.mubr.f32.mxu1 %v3673_v36  ;;  %2880 = vmatprep.subr.mxu1 %v1676_v14  ;;  %v1665_v36 = vld [vmem:[%s4166_s11 + $0x18] sm:$0xff] }
 0x18e   :  { %2937 = vmatpush3.msra.mxu0 %v3753_v13  ;;  %2881 = vmatpush3.msra.mxu1 %v1676_v14 }
 0x18f   :  { %2861 = vmatmul.mubr.f32.gmra.mxu0 %v2582_v63  ;;  %v610_v2 = vpop.f32.mrf.mxu1  ;;  %2938 = vmatprep.subr.mxu0 %v3763_v15 }
 0x190   :  { %2805 = vmatmul.mubr.f32.gmra.mxu1 %v3667_v34  ;;  %2863 = vmatprep.mubr.f32.mxu0 %v610_v2  ;;  %v1666_v34 = vld [vmem:[%s4166_s11 + $0x20] sm:$0xff] }
 0x191   :  { %v2588_v3 = vpop.f32.mrf.mxu1  ;;  %2807 = vmatprep.mubr.f32.mxu1 %v3685_v40  ;;  %2882 = vmatprep.subr.mxu1 %v1675_v16  ;;  %v1663_v40 = vld [vmem:[%s4166_s11 + $0x8] sm:$0xff] }
 0x192   :  { %2939 = vmatpush3.msra.mxu0 %v3763_v15  ;;  %2883 = vmatpush3.msra.mxu1 %v1675_v16 }
 0x193   :  { %2864 = vmatmul.mubr.f32.gmra.mxu0 %v2585_v1  ;;  %v620_v4 = vpop.f32.mrf.mxu1  ;;  %2940 = vmatprep.subr.mxu0 %v3773_v17 }
 0x194   :  { %2808 = vmatmul.mubr.f32.gmra.mxu1 %v3679_v38  ;;  %2866 = vmatprep.mubr.f32.mxu0 %v620_v4  ;;  %v1664_v38 = vld [vmem:[%s4166_s11 + $0x10] sm:$0xff] }
 0x195   :  { %v2591_v5 = vpop.f32.mrf.mxu1  ;;  %2810 = vmatprep.mubr.f32.mxu1 %v3697_v44  ;;  %2884 = vmatprep.subr.mxu1 %v1674_v18 }
 0x196   :  { %2941 = vmatpush3.msra.mxu0 %v3773_v17  ;;  %2885 = vmatpush3.msra.mxu1 %v1674_v18 }
 0x197   :  { %2867 = vmatmul.mubr.f32.gmra.mxu0 %v2588_v3  ;;  %v630_v6 = vpop.f32.mrf.mxu1  ;;  %2942 = vmatprep.subr.mxu0 %v3783_v19 }
 0x198   :  { %2811 = vmatmul.mubr.f32.gmra.mxu1 %v3691_v42  ;;  %2869 = vmatprep.mubr.f32.mxu0 %v630_v6  ;;  %v1662_v42 = vld [vmem:[%s4166_s11] sm:$0xff] }
 0x199   :  { %v2594_v7 = vpop.f32.mrf.mxu1  ;;  %2813 = vmatprep.mubr.f32.mxu1 %v903_v48  ;;  %2886 = vmatprep.subr.mxu1 %v1673_v20 }
 0x19a   :  { %2943 = vmatpush3.msra.mxu0 %v3783_v19  ;;  %2887 = vmatpush3.msra.mxu1 %v1673_v20 }
 0x19b   :  { %2870 = vmatmul.mubr.f32.gmra.mxu0 %v2591_v5  ;;  %v640_v8 = vpop.f32.mrf.mxu1  ;;  %2944 = vmatprep.subr.mxu0 %v3793_v21 }
 0x19c   :  { %2814 = vmatmul.mubr.f32.gmra.mxu1 %v3703_v46  ;;  %2872 = vmatprep.mubr.f32.mxu0 %v640_v8 }
 0x19d   :  { %v2597_v9 = vpop.f32.mrf.mxu1  ;;  %2816 = vmatprep.mubr.f32.mxu1 %v913_v52  ;;  %2888 = vmatprep.subr.mxu1 %v1672_v22 }
 0x19e   :  { %2945 = vmatpush3.msra.mxu0 %v3793_v21  ;;  %2889 = vmatpush3.msra.mxu1 %v1672_v22 }
 0x19f   :  { %2873 = vmatmul.mubr.f32.gmra.mxu0 %v2594_v7  ;;  %v650_v10 = vpop.f32.mrf.mxu1  ;;  %2946 = vmatprep.subr.mxu0 %v3803_v23 }
 0x1a0   :  { %2817 = vmatmul.mubr.f32.gmra.mxu1 %v3712_v50  ;;  %2875 = vmatprep.mubr.f32.mxu0 %v650_v10 }
 0x1a1   :  { %2819 = vmatprep.mubr.f32.mxu1 %v923_v58  ;;  %2890 = vmatprep.subr.mxu1 %v1671_v24 }
 0x1a2   :  { %2947 = vmatpush3.msra.mxu0 %v3803_v23  ;;  %2891 = vmatpush3.msra.mxu1 %v1671_v24 }
 0x1a3   :  { %2876 = vmatmul.mubr.f32.gmra.mxu0 %v2597_v9  ;;  %2948 = vmatprep.subr.mxu0 %v3813_v25 }
 0x1a4   :  { %2820 = vmatmul.mubr.f32.gmra.mxu1 %v2653_v56  ;;  %2892 = vmatprep.subr.mxu1 %v1670_v26 }
 0x1a5   :  { %2949 = vmatpush3.msra.mxu0 %v3813_v25  ;;  %2893 = vmatpush3.msra.mxu1 %v1670_v26 }
 0x1a6   :  { %2950 = vmatprep.subr.mxu0 %v3823_v27  ;;  %2894 = vmatprep.subr.mxu1 %v1669_v28 }
 0x1a7   :  { %2951 = vmatpush3.msra.mxu0 %v3823_v27  ;;  %2895 = vmatpush3.msra.mxu1 %v1669_v28 }
 0x1a8   :  { %2952 = vmatprep.subr.mxu0 %v3833_v29  ;;  %2896 = vmatprep.subr.mxu1 %v1668_v30 }
 0x1a9   :  { %2953 = vmatpush3.msra.mxu0 %v3833_v29  ;;  %2897 = vmatpush3.msra.mxu1 %v1668_v30 }
 0x1aa   :  { %2954 = vmatprep.subr.mxu0 %v3843_v31  ;;  %2898 = vmatprep.subr.mxu1 %v1667_v32 }
 0x1ab   :  { %2955 = vmatpush3.msra.mxu0 %v3843_v31  ;;  %2899 = vmatpush3.msra.mxu1 %v1667_v32 }
 0x1ac   :  { %2956 = vmatprep.subr.mxu0 %v3853_v33  ;;  %2900 = vmatprep.subr.mxu1 %v1666_v34 }
 0x1ad   :  { %2957 = vmatpush3.msra.mxu0 %v3853_v33  ;;  %2901 = vmatpush3.msra.mxu1 %v1666_v34 }
 0x1ae   :  { %2958 = vmatprep.subr.mxu0 %v3863_v35  ;;  %2902 = vmatprep.subr.mxu1 %v1665_v36 }
 0x1af   :  { %2959 = vmatpush3.msra.mxu0 %v3863_v35  ;;  %2903 = vmatpush3.msra.mxu1 %v1665_v36 }
 0x1b0   :  { %2960 = vmatprep.subr.mxu0 %v3873_v37  ;;  %2904 = vmatprep.subr.mxu1 %v1664_v38 }
 0x1b1   :  { %2961 = vmatpush3.msra.mxu0 %v3873_v37  ;;  %2905 = vmatpush3.msra.mxu1 %v1664_v38 }
 0x1b2   :  { %2962 = vmatprep.subr.mxu0 %v3883_v39  ;;  %2906 = vmatprep.subr.mxu1 %v1663_v40 }
 0x1b3   :  { %2963 = vmatpush3.msra.mxu0 %v3883_v39  ;;  %2907 = vmatpush3.msra.mxu1 %v1663_v40 }
 0x1b4   :  { %2964 = vmatprep.subr.mxu0 %v3893_v41  ;;  %2908 = vmatprep.subr.mxu1 %v1662_v42 }
 0x1b5   :  { %2965 = vmatpush3.msra.mxu0 %v3893_v41  ;;  %2909 = vmatpush3.msra.mxu1 %v1662_v42 }
 0x1b6   :  { %2990 = vmatprep.subr.mxu1 %v3743_v11 }
 0x208   :  { %v2744_v43 = vpop.f32.mrf.mxu0 }
 0x20a   :  { %v1175_v44 = vpop.f32.mrf.mxu0 }
 0x20c   :  { %v2747_v45 = vpop.f32.mrf.mxu0 }
 0x20e   :  { %v1185_v46 = vpop.f32.mrf.mxu0 }
 0x210   :  { %v2750_v47 = vpop.f32.mrf.mxu0 }
 0x212   :  { %v1195_v48 = vpop.f32.mrf.mxu0 }
 0x214   :  { %v2753_v49 = vpop.f32.mrf.mxu0 }
 0x216   :  { %v1205_v50 = vpop.f32.mrf.mxu0 }
 0x218   :  { %v2756_v52 = vpop.f32.mrf.mxu0 }
 0x21a   :  { %v1215_v58 = vpop.f32.mrf.mxu0 }
 0x21c   :  { %v2759_v63 = vpop.f32.mrf.mxu0 }
 0x21e   :  { %v1225_v4 = vpop.f32.mrf.mxu0 }
 0x220   :  { %v2762_v9 = vpop.f32.mrf.mxu0 }
 0x222   :  { %v1235_v18 = vpop.f32.mrf.mxu0 }
 0x224   :  { %v2765_v28 = vpop.f32.mrf.mxu0 }
 0x226   :  { %v1245_v38 = vpop.f32.mrf.mxu0 }
 0x228   :  { %v2688_v51 = vpop.f32.mrf.mxu1 }
 0x229   :  { %v3901_v54 = vadd.f32 %v2744_v43, %v2688_v51 }
 0x22a   :  { %v1030_v56 = vpop.f32.mrf.mxu1 }
 0x22b   :  { %v3903_v55 = vadd.f32 %v1175_v44, %v1030_v56 }
 0x22c   :  { %v2691_v57 = vpop.f32.mrf.mxu1 }
 0x22d   :  { %v3905_v59 = vadd.f32 %v2747_v45, %v2691_v57 }
 0x22e   :  { %v1040_v60 = vpop.f32.mrf.mxu1 }
 0x22f   :  { %v3907_v61 = vadd.f32 %v1185_v46, %v1040_v60 }
 0x230   :  { %v2694_v62 = vpop.f32.mrf.mxu1 }
 0x231   :  { %v3909_v0 = vadd.f32 %v2750_v47, %v2694_v62 }
 0x232   :  { %v1050_v1 = vpop.f32.mrf.mxu1 }
 0x233   :  { %v3911_v2 = vadd.f32 %v1195_v48, %v1050_v1  ;;  %v3936_v48 = vld [vmem:[%s4167_s10] ss:$0 sm:$0xff] }
 0x234   :  { %v2697_v3 = vpop.f32.mrf.mxu1 }
 0x235   :  { %v3913_v5 = vadd.f32 %v2753_v49, %v2697_v3 }
 0x236   :  { %v1060_v6 = vpop.f32.mrf.mxu1 }
 0x237   :  { %v3915_v7 = vadd.f32 %v1205_v50, %v1060_v6 }
 0x238   :  { %v2700_v8 = vpop.f32.mrf.mxu1 }
 0x239   :  { %v3917_v10 = vadd.f32 %v2756_v52, %v2700_v8 }
 0x23a   :  { %v1070_v12 = vpop.f32.mrf.mxu1 }
 0x23b   :  { %v3919_v14 = vadd.f32 %v1215_v58, %v1070_v12 }
 0x23c   :  { %v2703_v16 = vpop.f32.mrf.mxu1 }
 0x23d   :  { %v3921_v20 = vadd.f32 %v2759_v63, %v2703_v16 }
 0x23e   :  { %v1080_v22 = vpop.f32.mrf.mxu1 }
 0x23f   :  { %v3923_v24 = vadd.f32 %v1225_v4, %v1080_v22 }
 0x240   :  { %v2706_v26 = vpop.f32.mrf.mxu1 }
 0x241   :  { %v3925_v30 = vadd.f32 %v2762_v9, %v2706_v26 }
 0x242   :  { %v1090_v32 = vpop.f32.mrf.mxu1 }
 0x243   :  { %v3927_v34 = vadd.f32 %v1235_v18, %v1090_v32 }
 0x244   :  { %v2709_v36 = vpop.f32.mrf.mxu1 }
 0x245   :  { %v3929_v40 = vadd.f32 %v2765_v28, %v2709_v36 }
 0x246   :  { %v1100_v42 = vpop.f32.mrf.mxu1 }
 0x247   :  { %v2856_v43 = vpop.f32.mrf.mxu0  ;;  %v3931_v44 = vadd.f32 %v1245_v38, %v1100_v42 }
 0x248   :  { %v2800_v45 = vpop.f32.mrf.mxu1 }
 0x249   :  { %v1536_v46 = vpop.f32.mrf.mxu0  ;;  %v1542_v47 = vadd.f32 %v2856_v43, %v2800_v45 }
 0x24a   :  { %v1391_v49 = vpop.f32.mrf.mxu1 }
 0x24b   :  { %v2859_v50 = vpop.f32.mrf.mxu0  ;;  %v1537_v51 = vadd.f32 %v1536_v46, %v1391_v49  ;;  %v1623_v52 = vadd.f32 %v3936_v48, %v1542_v47 }
 0x24c   :  { %v2803_v56 = vpop.f32.mrf.mxu1 }
 0x24d   :  { %v1622_v57 = vadd.f32 %v3936_v48, %v1537_v51  ;;  %v1546_v58 = vpop.f32.mrf.mxu0  ;;  %v1552_v60 = vadd.f32 %v2859_v50, %v2803_v56 }
 0x24e   :  { %v1401_v62 = vpop.f32.mrf.mxu1 }
 0x24f   :  { %3027 = vtanh.f32 %v1622_v57  ;;  %v2862_v63 = vpop.f32.mrf.mxu0  ;;  %v1547_v1 = vadd.f32 %v1546_v58, %v1401_v62  ;;  %v1625_v3 = vadd.f32 %v3936_v48, %v1552_v60 }
 0x250   :  { %3029 = vtanh.f32 %v1623_v52  ;;  %v2806_v4 = vpop.f32.mrf.mxu1 }
 0x251   :  { %v1624_v6 = vadd.f32 %v3936_v48, %v1547_v1  ;;  %v1556_v8 = vpop.f32.mrf.mxu0  ;;  %v1562_v9 = vadd.f32 %v2862_v63, %v2806_v4 }
 0x252   :  { %v1411_v12 = vpop.f32.mrf.mxu1 }
 0x253   :  { %3031 = vtanh.f32 %v1624_v6  ;;  %v2865_v16 = vpop.f32.mrf.mxu0  ;;  %v1557_v18 = vadd.f32 %v1556_v8, %v1411_v12  ;;  %v1627_v26 = vadd.f32 %v3936_v48, %v1562_v9 }
 0x254   :  { %3033 = vtanh.f32 %v1625_v3  ;;  %v2809_v22 = vpop.f32.mrf.mxu1 }
 0x255   :  { %v1626_v28 = vadd.f32 %v3936_v48, %v1557_v18  ;;  %v1566_v32 = vpop.f32.mrf.mxu0  ;;  %v1572_v36 = vadd.f32 %v2865_v16, %v2809_v22 }
 0x256   :  { %v1421_v38 = vpop.f32.mrf.mxu1 }
 0x257   :  { %3035 = vtanh.f32 %v1626_v28  ;;  %v2868_v42 = vpop.f32.mrf.mxu0  ;;  %v1567_v43 = vadd.f32 %v1566_v32, %v1421_v38  ;;  %v1629_v46 = vadd.f32 %v3936_v48, %v1572_v36 }
 0x258   :  { %v2812_v45 = vpop.f32.mrf.mxu1  ;;  %3037 = vtanh.f32 %v1627_v26 }
 0x259   :  { %v1628_v47 = vadd.f32 %v3936_v48, %v1567_v43  ;;  %v1576_v49 = vpop.f32.mrf.mxu0  ;;  %v1582_v50 = vadd.f32 %v2868_v42, %v2812_v45 }
 0x25a   :  { %v1431_v51 = vpop.f32.mrf.mxu1 }
 0x25b   :  { %3039 = vtanh.f32 %v1628_v47  ;;  %v2871_v52 = vpop.f32.mrf.mxu0  ;;  %v1577_v56 = vadd.f32 %v1576_v49, %v1431_v51  ;;  %v1631_v62 = vadd.f32 %v3936_v48, %v1582_v50 }
 0x25c   :  { %v3028_v57 = vpop.eup %3027  ;;  %v2815_v58 = vpop.f32.mrf.mxu1  ;;  %3041 = vtanh.f32 %v1629_v46 }
 0x25d   :  { %v3030_v60 = vpop.eup %3029  ;;  %v1630_v63 = vadd.f32 %v3936_v48, %v1577_v56  ;;  %v1586_v1 = vpop.f32.mrf.mxu0  ;;  %v1592_v3 = vadd.f32 %v2871_v52, %v2815_v58  ;;  %2910 = vmatprep.mubr.f32.mxu1 %v3028_v57  ;;  %2966 = vmatprep.mubr.f32.mxu0 %v3028_v57 }
 0x25e   :  { %v1441_v4 = vpop.f32.mrf.mxu1  ;;  %2911 = vmatmul.mubr.f32.vlgmr.msra.gmra.mxu1 %v3030_v60  ;;  %2967 = vmatmul.mubr.f32.vlgmr.msra.gmra.mxu0 %v3030_v60 }
 0x25f   :  { %3043 = vtanh.f32 %v1630_v63  ;;  %v2874_v6 = vpop.f32.mrf.mxu0  ;;  %v1587_v8 = vadd.f32 %v1586_v1, %v1441_v4  ;;  %3006 = vmatpush3.msra.mxu1 %v3743_v11  ;;  %v1633_v18 = vadd.f32 %v3936_v48, %v1592_v3 }
 0x260   :  { %v3032_v9 = vpop.eup %3031  ;;  %v2818_v12 = vpop.f32.mrf.mxu1  ;;  %2991 = vmatprep.subr.mxu1 %v3753_v13  ;;  %3045 = vtanh.f32 %v1631_v62 }
 0x261   :  { %v3034_v16 = vpop.eup %3033  ;;  %v1632_v22 = vadd.f32 %v3936_v48, %v1587_v8  ;;  %v1596_v26 = vpop.f32.mrf.mxu0  ;;  %v1602_v28 = vadd.f32 %v2874_v6, %v2818_v12  ;;  %2913 = vmatprep.mubr.f32.mxu1 %v3032_v9  ;;  %3007 = vmatpush3.msra.mxu1 %v3753_v13 }
 0x262   :  { %2969 = vmatprep.mubr.f32.mxu0 %v3032_v9  ;;  %v1451_v32 = vpop.f32.mrf.mxu1  ;;  %2914 = vmatmul.mubr.f32.gmra.mxu1 %v3034_v16 }
 0x263   :  { %3047 = vtanh.f32 %v1632_v22  ;;  %v2877_v11 = vpop.f32.mrf.mxu0  ;;  %v1597_v36 = vadd.f32 %v1596_v26, %v1451_v32  ;;  %2992 = vmatprep.subr.mxu1 %v3763_v15  ;;  %2970 = vmatmul.mubr.f32.gmra.mxu0 %v3034_v16  ;;  %v1635_v43 = vadd.f32 %v3936_v48, %v1602_v28 }
 0x264   :  { %v3036_v38 = vpop.eup %3035  ;;  %3008 = vmatpush3.msra.mxu1 %v3763_v15  ;;  %v2821_v42 = vpop.f32.mrf.mxu1  ;;  %3049 = vtanh.f32 %v1633_v18 }
 0x265   :  { %v1634_v45 = vadd.f32 %v3936_v48, %v1597_v36  ;;  %v1612_v46 = vadd.f32 %v2877_v11, %v2821_v42  ;;  %2993 = vmatprep.subr.mxu1 %v3773_v17  ;;  %2916 = vmatprep.mubr.f32.mxu1 %v3036_v38  ;;  %v3038_v13 = vpop.eup %3037  ;;  %v1606_v47 = vpop.f32.mrf.mxu0 }
 0x266   :  { %3009 = vmatpush3.msra.mxu1 %v3773_v17  ;;  %2972 = vmatprep.mubr.f32.mxu0 %v3036_v38  ;;  %v1461_v49 = vpop.f32.mrf.mxu1 }
 0x267   :  { %3051 = vtanh.f32 %v1634_v45  ;;  %v1607_v50 = vadd.f32 %v1606_v47, %v1461_v49  ;;  %2917 = vmatmul.mubr.f32.gmra.mxu1 %v3038_v13  ;;  %2994 = vmatprep.subr.mxu1 %v3783_v19  ;;  %v1637_v51 = vadd.f32 %v3936_v48, %v1612_v46 }
 0x268   :  { %v3040_v15 = vpop.eup %3039  ;;  %2973 = vmatmul.mubr.f32.gmra.mxu0 %v3038_v13  ;;  %3010 = vmatpush3.msra.mxu1 %v3783_v19  ;;  %3053 = vtanh.f32 %v1635_v43 }
 0x269   :  { %v1636_v52 = vadd.f32 %v3936_v48, %v1607_v50  ;;  %2995 = vmatprep.subr.mxu1 %v3793_v21  ;;  %2919 = vmatprep.mubr.f32.mxu1 %v3040_v15  ;;  %v3042_v17 = vpop.eup %3041 }
 0x26a   :  { %3011 = vmatpush3.msra.mxu1 %v3793_v21  ;;  %2975 = vmatprep.mubr.f32.mxu0 %v3040_v15 }
 0x26b   :  { %3055 = vtanh.f32 %v1636_v52  ;;  %2920 = vmatmul.mubr.f32.gmra.mxu1 %v3042_v17  ;;  %2996 = vmatprep.subr.mxu1 %v3803_v23 }
 0x26c   :  { %v3044_v56 = vpop.eup %3043  ;;  %2976 = vmatmul.mubr.f32.gmra.mxu0 %v3042_v17  ;;  %3012 = vmatpush3.msra.mxu1 %v3803_v23  ;;  %3057 = vtanh.f32 %v1637_v51 }
 0x26d   :  { %2997 = vmatprep.subr.mxu1 %v3813_v25  ;;  %2922 = vmatprep.mubr.f32.mxu1 %v3044_v56  ;;  %v3046_v19 = vpop.eup %3045 }
 0x26e   :  { %3013 = vmatpush3.msra.mxu1 %v3813_v25 }
 0x26f   :  { %2923 = vmatmul.mubr.f32.gmra.mxu1 %v3046_v19  ;;  %2998 = vmatprep.subr.mxu1 %v3823_v27 }
 0x270   :  { %v3048_v21 = vpop.eup %3047  ;;  %3014 = vmatpush3.msra.mxu1 %v3823_v27 }
 0x271   :  { %2999 = vmatprep.subr.mxu1 %v3833_v29  ;;  %2925 = vmatprep.mubr.f32.mxu1 %v3048_v21  ;;  %v3050_v48 = vpop.eup %3049 }
 0x272   :  { %3015 = vmatpush3.msra.mxu1 %v3833_v29 }
 0x273   :  { %2926 = vmatmul.mubr.f32.gmra.mxu1 %v3050_v48  ;;  %3000 = vmatprep.subr.mxu1 %v3843_v31 }
 0x274   :  { %v3052_v23 = vpop.eup %3051  ;;  %3016 = vmatpush3.msra.mxu1 %v3843_v31  ;;  %v3988_v31 = vld [vmem:[%s4168_s7] ss:$0 sm:$0xff] }
 0x275   :  { %3001 = vmatprep.subr.mxu1 %v3853_v33  ;;  %2928 = vmatprep.mubr.f32.mxu1 %v3052_v23  ;;  %v3054_v25 = vpop.eup %3053  ;;  %v1267_v1 = vadd.f32 %v3988_v31, %v3915_v7  ;;  %v1268_v7 = vadd.f32 %v3988_v31, %v3913_v5  ;;  %v1269_v28 = vadd.f32 %v3988_v31, %v3919_v14 }
 0x276   :  { %3017 = vmatpush3.msra.mxu1 %v3853_v33  ;;  %v1262_v33 = vadd.f32 %v3988_v31, %v3901_v54  ;;  %v1271_v45 = vadd.f32 %v3988_v31, %v3923_v24  ;;  %v1270_v14 = vadd.f32 %v3988_v31, %v3917_v10  ;;  %v1273_v15 = vadd.f32 %v3988_v31, %v3927_v34 }
 0x277   :  { %2929 = vmatmul.mubr.f32.gmra.mxu1 %v3054_v25  ;;  %3002 = vmatprep.subr.mxu1 %v3863_v35  ;;  %v1275_v10 = vadd.f32 %v3988_v31, %v3931_v44  ;;  %v1276_v44 = vadd.f32 %v3988_v31, %v3929_v40 }
 0x278   :  { %v3056_v27 = vpop.eup %3055  ;;  %3018 = vmatpush3.msra.mxu1 %v3863_v35  ;;  %3059 = vtanh.f32 %v1262_v33  ;;  %v1261_v35 = vadd.f32 %v3988_v31, %v3903_v55  ;;  %v1266_v55 = vadd.f32 %v3988_v31, %v3909_v0 }
 0x279   :  { %3003 = vmatprep.subr.mxu1 %v3873_v37  ;;  %2931 = vmatprep.mubr.f32.mxu1 %v3056_v27  ;;  %v3058_v29 = vpop.eup %3057 }
 0x27a   :  { %3019 = vmatpush3.msra.mxu1 %v3873_v37  ;;  %v1264_v37 = vadd.f32 %v3988_v31, %v3905_v59  ;;  %3061 = vtanh.f32 %v1261_v35 }
 0x27b   :  { %2932 = vmatmul.mubr.f32.gmra.mxu1 %v3058_v29  ;;  %3004 = vmatprep.subr.mxu1 %v3883_v39 }
 0x27c   :  { %3020 = vmatpush3.msra.mxu1 %v3883_v39  ;;  %2978 = vmatprep.mubr.f32.mxu1 %v3044_v56  ;;  %v1263_v39 = vadd.f32 %v3988_v31, %v3907_v61  ;;  %3063 = vtanh.f32 %v1264_v37 }
 0x27d   :  { %3005 = vmatprep.subr.mxu1 %v3893_v41 }
 0x27e   :  { %3021 = vmatpush3.msra.mxu1 %v3893_v41  ;;  %3065 = vtanh.f32 %v1263_v39  ;;  %v1265_v41 = vadd.f32 %v3988_v31, %v3911_v2 }
 0x27f   :  { %2979 = vmatmul.mubr.f32.vlgmr.msra.gmra.mxu1 %v3046_v19  ;;  %v1272_v19 = vadd.f32 %v3988_v31, %v3921_v20 }
 0x280   :  { %2981 = vmatprep.mubr.f32.mxu1 %v3048_v21  ;;  %3067 = vtanh.f32 %v1265_v41 }
 0x281   :  { %3069 = vtanh.f32 %v1266_v55 }
 0x282   :  { %3071 = vtanh.f32 %v1267_v1 }
 0x283   :  { %2982 = vmatmul.mubr.f32.gmra.mxu1 %v3050_v48  ;;  %3073 = vtanh.f32 %v1268_v7 }
 0x284   :  { %2984 = vmatprep.mubr.f32.mxu1 %v3052_v23  ;;  %3075 = vtanh.f32 %v1269_v28 }
 0x285   :  { %v3060_v57 = vpop.eup %3059  ;;  %3077 = vtanh.f32 %v1271_v45 }
 0x286   :  { %3079 = vtanh.f32 %v1270_v14 }
 0x287   :  { %2985 = vmatmul.mubr.f32.gmra.mxu1 %v3054_v25  ;;  %v3062_v61 = vpop.eup %3061  ;;  %3081 = vtanh.f32 %v1273_v15 }
 0x288   :  { %2987 = vmatprep.mubr.f32.mxu1 %v3056_v27  ;;  %3083 = vtanh.f32 %v1272_v19 }
 0x289   :  { %v3064_v9 = vpop.eup %3063  ;;  %3085 = vtanh.f32 %v1275_v10 }
 0x28b   :  { %2988 = vmatmul.mubr.f32.gmra.mxu1 %v3058_v29  ;;  %v3066_v0 = vpop.eup %3065  ;;  %v1274_v29 = vadd.f32 %v3988_v31, %v3925_v30 }
 0x28d   :  { %v3068_v11 = vpop.eup %3067  ;;  %3087 = vtanh.f32 %v1274_v29 }
 0x28e   :  { %v3070_v50 = vpop.eup %3069  ;;  %3089 = vtanh.f32 %v1276_v44 }
 0x28f   :  { %v3072_v52 = vpop.eup %3071 }
 0x290   :  { %v3074_v27 = vpop.eup %3073 }
 0x291   :  { %v3076_v20 = vpop.eup %3075 }
 0x31e   :  { %v2912_v58 = vpop.f32.mrf.mxu1  ;;  %v2968_v54 = vpop.f32.mrf.mxu0 }
 0x31f   :  { %v1824_v60 = vmul.f32 %v3060_v57, %v2912_v58  ;;  %v2067_v62 = vmul.f32 %v3060_v57, %v2968_v54  ;;  %v3078_v57 = vpop.eup %3077 }
 0x320   :  { %v1744_v63 = vpop.f32.mrf.mxu1  ;;  %v1987_v59 = vpop.f32.mrf.mxu0 }
 0x321   :  { %2084 = vadd.xlane.f32.xlu0 %v2067_v62  ;;  %1841 = vadd.xlane.f32.xlu1 %v1824_v60  ;;  %v1823_v4 = vmul.f32 %v3062_v61, %v1744_v63  ;;  %v2066_v2 = vmul.f32 %v3062_v61, %v1987_v59  ;;  %v3080_v30 = vpop.eup %3079 }
 0x322   :  { %v2915_v3 = vpop.f32.mrf.mxu1  ;;  %v3082_v55 = vpop.eup %3081 }
 0x323   :  { %v2971_v6 = vpop.f32.mrf.mxu0  ;;  %v1826_v16 = vmul.f32 %v3064_v9, %v2915_v3  ;;  %v3084_v61 = vpop.eup %3083 }
 0x324   :  { %v1754_v8 = vpop.f32.mrf.mxu1  ;;  %v2069_v36 = vmul.f32 %v3064_v9, %v2971_v6  ;;  %v3086_v40 = vpop.eup %3085 }
 0x325   :  { %v1997_v12 = vpop.f32.mrf.mxu0  ;;  %2082 = vadd.xlane.f32.xlu1 %v2066_v2  ;;  %1839 = vadd.xlane.f32.xlu0 %v1823_v4  ;;  %v1825_v5 = vmul.f32 %v3066_v0, %v1754_v8  ;;  %v3088_v6 = vpop.eup %3087 }
 0x326   :  { %v2068_v18 = vmul.f32 %v3066_v0, %v1997_v12  ;;  %v3090_v0 = vpop.eup %3089 }
 0x327   :  { %v2918_v22 = vpop.f32.mrf.mxu1 }
 0x328   :  { %v2974_v26 = vpop.f32.mrf.mxu0  ;;  %v1828_v24 = vmul.f32 %v3070_v50, %v2918_v22 }
 0x329   :  { %v1764_v32 = vpop.f32.mrf.mxu1  ;;  %2086 = vadd.xlane.f32.xlu1 %v2068_v18  ;;  %1845 = vadd.xlane.f32.xlu0 %v1826_v16  ;;  %v2071_v34 = vmul.f32 %v3070_v50, %v2974_v26 }
 0x32a   :  { %v1827_v38 = vmul.f32 %v3068_v11, %v1764_v32  ;;  %v2007_v43 = vpop.f32.mrf.mxu0 }
 0x32b   :  { %v2921_v42 = vpop.f32.mrf.mxu1  ;;  %v2070_v13 = vmul.f32 %v3068_v11, %v2007_v43 }
 0x32c   :  { %v2977_v49 = vpop.f32.mrf.mxu0  ;;  %v1830_v35 = vmul.f32 %v3074_v27, %v2921_v42  ;;  %v4026_v42 = vld [vmem:[%s4169_s12] ss:$0 sm:$0xff] }
 0x32d   :  { %v1774_v46 = vpop.f32.mrf.mxu1  ;;  %2088 = vadd.xlane.f32.xlu0 %v2069_v36  ;;  %1847 = vadd.xlane.f32.xlu1 %v1827_v38  ;;  %v2073_v58 = vmul.f32 %v3074_v27, %v2977_v49 }
 0x32e   :  { %v1829_v17 = vmul.f32 %v3072_v52, %v1774_v46  ;;  %v2017_v21 = vpop.f32.mrf.mxu0 }
 0x32f   :  { %v2924_v47 = vpop.f32.mrf.mxu1  ;;  %v2072_v23 = vmul.f32 %v3072_v52, %v2017_v21 }
 0x330   :  { %v1832_v63 = vmul.f32 %v3080_v30, %v2924_v47 }
 0x331   :  { %v1784_v51 = vpop.f32.mrf.mxu1  ;;  %1843 = vadd.xlane.f32.xlu0 %v1825_v5  ;;  %2090 = vadd.xlane.f32.xlu1 %v2070_v13 }
 0x332   :  { %v1831_v37 = vmul.f32 %v3076_v20, %v1784_v51 }
 0x333   :  { %v2927_v56 = vpop.f32.mrf.mxu1 }
 0x334   :  { %v1834_v31 = vmul.f32 %v3084_v61, %v2927_v56 }
 0x335   :  { %v1794_v48 = vpop.f32.mrf.mxu1  ;;  %1849 = vadd.xlane.f32.xlu0 %v1828_v24  ;;  %1851 = vadd.xlane.f32.xlu1 %v1829_v17 }
 0x336   :  { %v1833_v54 = vmul.f32 %v3078_v57, %v1794_v48 }
 0x337   :  { %v2930_v25 = vpop.f32.mrf.mxu1 }
 0x338   :  { %v1836_v8 = vmul.f32 %v3088_v6, %v2930_v25 }
 0x339   :  { %v1804_v33 = vpop.f32.mrf.mxu1  ;;  %2092 = vadd.xlane.f32.xlu0 %v2071_v34  ;;  %2094 = vadd.xlane.f32.xlu1 %v2072_v23 }
 0x33a   :  { %v1835_v59 = vmul.f32 %v3082_v55, %v1804_v33 }
 0x33b   :  { %v2933_v39 = vpop.f32.mrf.mxu1 }
 0x33c   :  { %v1838_v16 = vmul.f32 %v3090_v0, %v2933_v39 }
 0x33d   :  { %v1814_v41 = vpop.f32.mrf.mxu1  ;;  %1853 = vadd.xlane.f32.xlu0 %v1830_v35  ;;  %1855 = vadd.xlane.f32.xlu1 %v1831_v37 }
 0x33e   :  { %v1837_v4 = vmul.f32 %v3086_v40, %v1814_v41 }
 0x33f   :  { %v2980_v60 = vpop.f32.mrf.mxu1 }
 0x340   :  { %v2075_v7 = vmul.f32 %v3080_v30, %v2980_v60 }
 0x341   :  { %v2027_v62 = vpop.f32.mrf.mxu1  ;;  %2096 = vadd.xlane.f32.xlu0 %v2073_v58  ;;  %1859 = vadd.xlane.f32.xlu1 %v1833_v54 }
 0x342   :  { %v2074_v9 = vmul.f32 %v3076_v20, %v2027_v62 }
 0x343   :  { %v2983_v1 = vpop.f32.mrf.mxu1 }
 0x344   :  { %v2077_v32 = vmul.f32 %v3084_v61, %v2983_v1 }
 0x345   :  { %v2037_v3 = vpop.f32.mrf.mxu1  ;;  %1857 = vadd.xlane.f32.xlu0 %v1832_v63  ;;  %1863 = vadd.xlane.f32.xlu1 %v1835_v59 }
 0x346   :  { %v2076_v18 = vmul.f32 %v3078_v57, %v2037_v3 }
 0x347   :  { %v2986_v2 = vpop.f32.mrf.mxu1 }
 0x348   :  { %v2079_v36 = vmul.f32 %v3088_v6, %v2986_v2 }
 0x349   :  { %1861 = vadd.xlane.f32.xlu0 %v1834_v31  ;;  %1867 = vadd.xlane.f32.xlu1 %v1837_v4  ;;  %v2047_v12 = vpop.f32.mrf.mxu1 }
 0x34a   :  { %v2078_v26 = vmul.f32 %v3082_v55, %v2047_v12 }
 0x34b   :  { %v2989_v22 = vpop.f32.mrf.mxu1 }
 0x34c   :  { %v2081_v38 = vmul.f32 %v3090_v0, %v2989_v22 }
 0x34d   :  { %1865 = vadd.xlane.f32.xlu0 %v1836_v8  ;;  %2098 = vadd.xlane.f32.xlu1 %v2074_v9  ;;  %v2057_v28 = vpop.f32.mrf.mxu1 }
 0x34e   :  { %v2080_v11 = vmul.f32 %v3086_v40, %v2057_v28 }
 0x351   :  { %1869 = vadd.xlane.f32.xlu0 %v1838_v16  ;;  %2102 = vadd.xlane.f32.xlu1 %v2076_v18 }
 0x355   :  { %2100 = vadd.xlane.f32.xlu0 %v2075_v7  ;;  %2106 = vadd.xlane.f32.xlu1 %v2078_v26 }
 0x359   :  { %2104 = vadd.xlane.f32.xlu0 %v2077_v32  ;;  %2110 = vadd.xlane.f32.xlu1 %v2080_v11 }
 0x35d   :  { %2108 = vadd.xlane.f32.xlu0 %v2079_v36 }
 0x361   :  { %2112 = vadd.xlane.f32.xlu0 %v2081_v38 }
 0x3aa   :  { %v2085_v43 = vpop.xlane.xlu0 %2084  ;;  %v1842_v45 = vpop.xlane.xlu1 %1841 }
 0x3ab   :  { %v1873_v46 = vsel %vm1871_vm0, %v1842_v45, 0.0  ;;  %v2116_v13 = vsel %vm2114_vm4, %v2085_v43, 0.0 }
 0x3ac   :  { %v1889_v5 = vadd.f32 %v4026_v42, %v1873_v46 }
 0x3ae   :  { %v2132_v47 = vadd.f32 %v2116_v13, %v1889_v5  ;;  %v2083_v14 = vpop.xlane.xlu1 %2082  ;;  %v1840_v49 = vpop.xlane.xlu0 %1839 }
 0x3af   :  { %v1872_v50 = vsel %vm1871_vm0, %v1840_v49, 0.0  ;;  %v2115_v51 = vsel %vm2114_vm4, %v2083_v14, 0.0 }
 0x3b0   :  { %2148 = vst [vmem:[%s4170_s13 + $0x8] sm:$0xff] %v2132_v47  ;;  %v1888_v15 = vadd.f32 %v4026_v42, %v1872_v50 }
 0x3b2   :  { %v2131_v52 = vadd.f32 %v2115_v51, %v1888_v15  ;;  %v2087_v24 = vpop.xlane.xlu1 %2086  ;;  %v1846_v17 = vpop.xlane.xlu0 %1845 }
 0x3b3   :  { %v1875_v56 = vsel %vm1871_vm0, %v1846_v17, 0.0  ;;  %v2117_v39 = vsel %vm2114_vm4, %v2087_v24, 0.0 }
 0x3b4   :  { %2147 = vst [vmem:[%s4170_s13] sm:$0xff] %v2131_v52  ;;  %v1891_v19 = vadd.f32 %v4026_v42, %v1875_v56 }
 0x3b6   :  { %v2089_v21 = vpop.xlane.xlu0 %2088  ;;  %v1848_v10 = vpop.xlane.xlu1 %1847 }
 0x3b7   :  { %v2118_v48 = vsel %vm2114_vm4, %v2089_v21, 0.0  ;;  %v1876_v34 = vsel %vm1871_vm0, %v1848_v10, 0.0 }
 0x3b8   :  { %v2134_v23 = vadd.f32 %v2118_v48, %v1891_v19  ;;  %v1892_v25 = vadd.f32 %v4026_v42, %v1876_v34 }
 0x3ba   :  { %2150 = vst [vmem:[%s4170_s13 + $0x18] sm:$0xff] %v2134_v23  ;;  %v1844_v27 = vpop.xlane.xlu0 %1843  ;;  %v2091_v29 = vpop.xlane.xlu1 %2090 }
 0x3bb   :  { %v1874_v33 = vsel %vm1871_vm0, %v1844_v27, 0.0  ;;  %v2119_v20 = vsel %vm2114_vm4, %v2091_v29, 0.0 }
 0x3bc   :  { %v1890_v35 = vadd.f32 %v4026_v42, %v1874_v33  ;;  %v2135_v37 = vadd.f32 %v2119_v20, %v1892_v25 }
 0x3be   :  { %v2133_v44 = vadd.f32 %v2117_v39, %v1890_v35  ;;  %2151 = vst [vmem:[%s4170_s13 + $0x20] sm:$0xff] %v2135_v37  ;;  %v1850_v41 = vpop.xlane.xlu0 %1849  ;;  %v1852_v57 = vpop.xlane.xlu1 %1851 }
 0x3bf   :  { %v1877_v58 = vsel %vm1871_vm0, %v1850_v41, 0.0  ;;  %v1878_v54 = vsel %vm1871_vm0, %v1852_v57, 0.0 }
 0x3c0   :  { %2149 = vst [vmem:[%s4170_s13 + $0x10] sm:$0xff] %v2133_v44  ;;  %v1893_v60 = vadd.f32 %v4026_v42, %v1877_v58  ;;  %v1894_v30 = vadd.f32 %v4026_v42, %v1878_v54 }
 0x3c2   :  { %v2093_v62 = vpop.xlane.xlu0 %2092  ;;  %v2095_v55 = vpop.xlane.xlu1 %2094 }
 0x3c3   :  { %v2120_v63 = vsel %vm2114_vm4, %v2093_v62, 0.0  ;;  %v2121_v59 = vsel %vm2114_vm4, %v2095_v55, 0.0 }
 0x3c4   :  { %v2136_v1 = vadd.f32 %v2120_v63, %v1893_v60  ;;  %v2137_v61 = vadd.f32 %v2121_v59, %v1894_v30 }
 0x3c6   :  { %2152 = vst [vmem:[%s4170_s13 + $0x28] sm:$0xff] %v2136_v1  ;;  %2153 = vst [vmem:[%s4170_s13 + $0x30] sm:$0xff] %v2137_v61  ;;  %v1854_v3 = vpop.xlane.xlu0 %1853  ;;  %v1856_v40 = vpop.xlane.xlu1 %1855 }
 0x3c7   :  { %v1879_v31 = vsel %vm1871_vm0, %v1854_v3, 0.0  ;;  %v1880_v22 = vsel %vm1871_vm0, %v1856_v40, 0.0 }
 0x3c8   :  { %v1895_v4 = vadd.f32 %v4026_v42, %v1879_v31  ;;  %v1896_v7 = vadd.f32 %v4026_v42, %v1880_v22 }
 0x3ca   :  { %v2097_v2 = vpop.xlane.xlu0 %2096  ;;  %v1860_v6 = vpop.xlane.xlu1 %1859 }
 0x3cb   :  { %v2122_v8 = vsel %vm2114_vm4, %v2097_v2, 0.0  ;;  %v1882_v32 = vsel %vm1871_vm0, %v1860_v6, 0.0 }
 0x3cc   :  { %v2138_v9 = vadd.f32 %v2122_v8, %v1895_v4  ;;  %v1898_v38 = vadd.f32 %v4026_v42, %v1882_v32 }
 0x3ce   :  { %2154 = vst [vmem:[%s4170_s13 + $0x38] sm:$0xff] %v2138_v9  ;;  %v1858_v12 = vpop.xlane.xlu0 %1857  ;;  %v1864_v0 = vpop.xlane.xlu1 %1863 }
 0x3cf   :  { %v1881_v46 = vsel %vm1871_vm0, %v1858_v12, 0.0  ;;  %v1884_v5 = vsel %vm1871_vm0, %v1864_v0, 0.0 }
 0x3d0   :  { %v1897_v14 = vadd.f32 %v4026_v42, %v1881_v46  ;;  %v1900_v49 = vadd.f32 %v4026_v42, %v1884_v5 }
 0x3d2   :  { %v1862_v16 = vpop.xlane.xlu0 %1861  ;;  %v1868_v18 = vpop.xlane.xlu1 %1867 }
 0x3d3   :  { %v1883_v51 = vsel %vm1871_vm0, %v1862_v16, 0.0  ;;  %v1886_v52 = vsel %vm1871_vm0, %v1868_v18, 0.0 }
 0x3d4   :  { %v1899_v21 = vadd.f32 %v4026_v42, %v1883_v51  ;;  %v1902_v10 = vadd.f32 %v4026_v42, %v1886_v52 }
 0x3d6   :  { %v1866_v26 = vpop.xlane.xlu0 %1865  ;;  %v2099_v28 = vpop.xlane.xlu1 %2098 }
 0x3d7   :  { %v2123_v11 = vsel %vm2114_vm4, %v2099_v28, 0.0  ;;  %v1885_v23 = vsel %vm1871_vm0, %v1866_v26, 0.0 }
 0x3d8   :  { %v2139_v36 = vadd.f32 %v2123_v11, %v1896_v7  ;;  %v1901_v20 = vadd.f32 %v4026_v42, %v1885_v23 }
 0x3da   :  { %2155 = vst [vmem:[%s4170_s13 + $0x40] sm:$0xff] %v2139_v36  ;;  %v1870_v43 = vpop.xlane.xlu0 %1869  ;;  %v2103_v45 = vpop.xlane.xlu1 %2102 }
 0x3db   :  { %v2125_v13 = vsel %vm2114_vm4, %v2103_v45, 0.0  ;;  %v1887_v37 = vsel %vm1871_vm0, %v1870_v43, 0.0 }
 0x3dc   :  { %v2141_v47 = vadd.f32 %v2125_v13, %v1898_v38  ;;  %v1903_v41 = vadd.f32 %v4026_v42, %v1887_v37 }
 0x3de   :  { %2157 = vst [vmem:[%s4170_s13 + $0x50] sm:$0xff] %v2141_v47  ;;  %v2101_v50 = vpop.xlane.xlu0 %2100  ;;  %v2107_v15 = vpop.xlane.xlu1 %2106 }
 0x3df   :  { %v2124_v24 = vsel %vm2114_vm4, %v2101_v50, 0.0  ;;  %v2127_v17 = vsel %vm2114_vm4, %v2107_v15, 0.0 }
 0x3e0   :  { %v2140_v56 = vadd.f32 %v2124_v24, %v1897_v14  ;;  %v2143_v19 = vadd.f32 %v2127_v17, %v1900_v49 }
 0x3e2   :  { %2156 = vst [vmem:[%s4170_s13 + $0x48] sm:$0xff] %v2140_v56  ;;  %2159 = vst [vmem:[%s4170_s13 + $0x60] sm:$0xff] %v2143_v19  ;;  %v2105_v48 = vpop.xlane.xlu0 %2104  ;;  %v2111_v34 = vpop.xlane.xlu1 %2110 }
 0x3e3   :  { %v2126_v25 = vsel %vm2114_vm4, %v2105_v48, 0.0  ;;  %v2129_v27 = vsel %vm2114_vm4, %v2111_v34, 0.0 }
 0x3e4   :  { %v2142_v29 = vadd.f32 %v2126_v25, %v1899_v21  ;;  %v2145_v33 = vadd.f32 %v2129_v27, %v1902_v10 }
 0x3e6   :  { %2158 = vst [vmem:[%s4170_s13 + $0x58] sm:$0xff] %v2142_v29  ;;  %2161 = vst [vmem:[%s4170_s13 + $0x70] sm:$0xff] %v2145_v33  ;;  %v2109_v35 = vpop.xlane.xlu0 %2108 }
 0x3e7   :  { %v2128_v39 = vsel %vm2114_vm4, %v2109_v35, 0.0 }
 0x3e8   :  { %v2144_v44 = vadd.f32 %v2128_v39, %v1901_v20 }
 0x3ea   :  { %2160 = vst [vmem:[%s4170_s13 + $0x68] sm:$0xff] %v2144_v44  ;;  %v2113_v57 = vpop.xlane.xlu0 %2112 }
 0x3eb   :  { %v2130_v58 = vsel %vm2114_vm4, %v2113_v57, 0.0 }
 0x3ec   :  { %v2146_v54 = vadd.f32 %v2130_v58, %v1903_v41 }
 0x3ee   :  { %2162 = vst [vmem:[%s4170_s13 + $0x78] sm:$0xff] %v2146_v54 }

</bundles_post_ra>
